<compile_context>
chip_gen: v7x
topology: tpu7x:2x2x1
jax: 0.10.0
libtpu: 0.0.40
codegen_flags: <defaults>
</compile_context>

<pallas_src>
from functools import partial

import jax
import jax.numpy as jnp
import numpy as np
from jax.experimental import pallas as pl
from jax.experimental.pallas import tpu as pltpu

KERNEL_SIZES = (5, 9, 13)      # SPP cascade: 9 = 5∘5, 13 = 5∘5∘5 (stride-1 max)
BASE_PAD = 2                   # base pool: k = 5, pad = 2
N_STAGES = len(KERNEL_SIZES)
HALO = BASE_PAD * N_STAGES     # rows/cols of -inf halo needed by the cascade (= 6)
LPAD = 8                       # left column halo, rounded up to a sublane multiple
RPAD = HALO                    # right column halo
LANE = 128


# ----------------------------------------------------------------------------
# Shared epilogue: exact SiLU via one EUP op (tanh)
# ----------------------------------------------------------------------------
def _silu(y):
    # y*sigmoid(y) == 0.5*y*(tanh(y/2)+1): one EUP op instead of exp + reciprocal.
    return 0.5 * y * (jnp.tanh(0.5 * y) + 1.0)


def _round_up(x, m):
    return ((x + m - 1) // m) * m


def _pad_axis(a, axis, new_size):
    pad = new_size - a.shape[axis]
    if pad == 0:
        return a
    widths = [(0, 0)] * a.ndim
    widths[axis] = (0, pad)
    return jnp.pad(a, widths)


# ----------------------------------------------------------------------------
# Kernel 1: conv1 — pointwise conv (BN scale pre-folded into w) + bias + SiLU
# ----------------------------------------------------------------------------
def _pw_conv_kernel(x_ref, w_ref, b_ref, o_ref):
    # x_ref: (tm, Cin), w_ref: (Cin, Cout), b_ref: (1, Cout), o_ref: (tm, Cout)
    y = jnp.dot(x_ref[...], w_ref[...], preferred_element_type=jnp.float32)
    # NOTE: on a masked M-tail the garbage rows go through tanh; those results
    # are dropped by the masked store (benign, but trips NaN debug checks).
    o_ref[...] = _silu(y + b_ref[...]).astype(o_ref.dtype)


def pw_conv_silu(x2d, w, b, out_dtype, tm=1024):
    M, Cin = x2d.shape
    Cout = w.shape[1]
    tm = min(tm, M)
    return pl.pallas_call(
        _pw_conv_kernel,
        out_shape=jax.ShapeDtypeStruct((M, Cout), out_dtype),
        grid=(pl.cdiv(M, tm),),                    # masked tail allowed
        in_specs=[
            pl.BlockSpec((tm, Cin), lambda i: (i, 0)),
            # TODO(synk): single-buffer these grid-invariant blocks
            # (pipeline_mode=pl.Buffered(1)) once supported on this pipeline.
            pl.BlockSpec((Cin, Cout), lambda i: (0, 0)),
            pl.BlockSpec((1, Cout), lambda i: (0, 0)),
        ],
        out_specs=pl.BlockSpec((tm, Cout), lambda i: (i, 0)),
        compiler_params=pltpu.CompilerParams(
            dimension_semantics=("parallel",),
            vmem_limit_bytes=64 * 1024 * 1024),
    )(x2d, w, b)


# ----------------------------------------------------------------------------
# Kernel 2: FUSED SPPF cascade pooling + de-concatenated conv2 + bias + SiLU
# ----------------------------------------------------------------------------
def _fused_pool_conv2_kernel(x1_hbm, w0_ref, w1_ref, w2_ref, w3_ref, b_ref,
                             o_ref, xb_ref, xp_ref, sem, *, H, W, th, nblk):
    n = pl.program_id(0)
    i = pl.program_id(1)
    C = xp_ref.shape[-1]
    Co = o_ref.shape[-1]
    win = th + 2 * HALO
    Wp = LPAD + W + RPAD
    dt = xp_ref.dtype

    # ---- -inf halos: write ONLY the border strips, never the full scratch ----
    xp_ref[:, 0:LPAD, :] = jnp.full((win, LPAD, C), -jnp.inf, dt)
    xp_ref[:, LPAD + W:Wp, :] = jnp.full((win, RPAD, C), -jnp.inf, dt)

    @pl.when(i == 0)
    def _():
        xb_ref[0:HALO, :, :] = jnp.full((HALO, W, C), -jnp.inf, dt)

    @pl.when(i == nblk - 1)
    def _():
        xb_ref[win - HALO:win, :, :] = jnp.full((HALO, W, C), -jnp.inf, dt)

    # ---- fetch the x1 rows this block needs (interior rows + live halo) ------
    def copy_rows(src_row, nrows, dst_row):
        cp = pltpu.make_async_copy(
            x1_hbm.at[n, pl.ds(src_row, nrows), :, :],
            xb_ref.at[pl.ds(dst_row, nrows), :, :],
            sem)
        cp.start()
        cp.wait()
    # TODO(synk): double-buffer xb and prefetch the next row block's DMA to
    # overlap it with this block's pooling + matmuls.

    if nblk == 1:
        copy_rows(0, H, HALO)
    else:
        @pl.when(i == 0)
        def _():
            copy_rows(0, th + HALO, HALO)

        @pl.when(i == nblk - 1)
        def _():
            copy_rows(H - (th + HALO), th + HALO, 0)

        if nblk > 2:
            @pl.when(jnp.logical_and(i > 0, i < nblk - 1))
            def _():
                copy_rows(i * th - HALO, win, 0)

    # place the fetched rows inside the column halo
    # TODO(synk): DMA straight into xp_ref[:, LPAD:LPAD+W, :] to drop this copy.
    xp_ref[:, LPAD:LPAD + W, :] = xb_ref[...]

    xp = xp_ref[...]
    k = 2 * BASE_PAD + 1   # 5

    def pool_valid(t):
        # 'VALID' k x k, stride-1 separable max.
        ro = t.shape[0] - (k - 1)
        co = t.shape[1] - (k - 1)
        r = t[0:ro]
        for dh in range(1, k):            # row shifts: leading axis (cheap)
            r = jnp.maximum(r, t[dh:dh + ro])
        o = r[:, 0:co]
        for dw in range(1, k):            # col shifts: sublane axis
            # TODO(synk): route these sublane shifts through pltpu.roll (XLU)
            # to take them off the load/store + VALU slots.
            o = jnp.maximum(o, r[:, dw:dw + co])
        return o

    # SPPF cascade over the -inf-halo'd block (exact pool5 / pool9 / pool13):
    q1 = pool_valid(xp)    # pool5  'same' result lives at offset (HALO-2, LPAD-2)
    q2 = pool_valid(q1)    # pool9                            offset (HALO-4, LPAD-4)
    q3 = pool_valid(q2)    # pool13                           offset (HALO-6, LPAD-6)

    M = th * W
    x1c = xp[HALO:HALO + th, LPAD:LPAD + W, :].reshape(M, C)
    p5 = q1[HALO - 2:HALO - 2 + th, LPAD - 2:LPAD - 2 + W, :].reshape(M, C)
    p9 = q2[HALO - 4:HALO - 4 + th, LPAD - 4:LPAD - 4 + W, :].reshape(M, C)
    p13 = q3[0:th, LPAD - HALO:LPAD - HALO + W, :].reshape(M, C)

    # de-concatenated conv2: chained f32 accumulation (MRB-friendly on v7x).
    y = jnp.dot(x1c, w0_ref[...], preferred_element_type=jnp.float32)
    y = y + jnp.dot(p5, w1_ref[...], preferred_element_type=jnp.float32)
    y = y + jnp.dot(p9, w2_ref[...], preferred_element_type=jnp.float32)
    y = y + jnp.dot(p13, w3_ref[...], preferred_element_type=jnp.float32)
    y = _silu(y + b_ref[...])
    o_ref[...] = y.reshape(1, th, W, Co).astype(o_ref.dtype)


def _pick_row_block(H, W, C, Co, act_bytes, budget=24 * 1024 * 1024):
    """Largest row block (power-of-two divisor of H, >=8) fitting the VMEM budget."""
    def est(th):
        win = th + 2 * HALO
        Wp = LPAD + W + RPAD
        xp = win * Wp * C * act_bytes          # halo'd scratch
        xb = win * W * C * act_bytes           # DMA landing buffer
        vals = 3 * xp                          # q1/q2 + branch slabs (rough)
        out = 2 * th * W * Co * 4              # f32 out, double buffered
        w2 = 2 * 4 * C * Co * act_bytes        # weights, double buffered
        acc = th * W * Co * 4                  # f32 accumulator
        return xp + xb + vals + out + w2 + acc

    th = H
    while est(th) > budget and th % 2 == 0 and th // 2 >= 8:
        th //= 2
    return th


def fused_spp_conv2(x1_nhwc, w2_parts, b2, out_dtype=jnp.float32, row_block=None):
    N, H, W, C = x1_nhwc.shape
    Co = w2_parts[0].shape[1]
    act_bytes = jnp.dtype(x1_nhwc.dtype).itemsize
    th = _pick_row_block(H, W, C, Co, act_bytes) if row_block is None else row_block
    assert H % th == 0, (H, th)
    nblk = H // th
    assert nblk == 1 or th >= 8, (H, th)
    win = th + 2 * HALO
    Wp = LPAD + W + RPAD

    w_spec = pl.BlockSpec((C, Co), lambda n, i: (0, 0))
    return pl.pallas_call(
        partial(_fused_pool_conv2_kernel, H=H, W=W, th=th, nblk=nblk),
        out_shape=jax.ShapeDtypeStruct((N, H, W, Co), out_dtype),
        grid=(N, nblk),
        in_specs=[pl.BlockSpec(memory_space=pl.ANY),   # x1 stays in HBM; manual halo DMA
                  w_spec, w_spec, w_spec, w_spec,
                  pl.BlockSpec((1, Co), lambda n, i: (0, 0))],
        out_specs=pl.BlockSpec((1, th, W, Co), lambda n, i: (n, i, 0, 0)),
        scratch_shapes=[
            pltpu.VMEM((win, W, C), x1_nhwc.dtype),    # xb: DMA landing buffer
            pltpu.VMEM((win, Wp, C), x1_nhwc.dtype),   # xp: -inf-halo'd block
            pltpu.SemaphoreType.DMA,
        ],
        compiler_params=pltpu.CompilerParams(
            dimension_semantics=("parallel", "arbitrary"),
            vmem_limit_bytes=64 * 1024 * 1024),
    )(x1_nhwc, *w2_parts, b2)


# ----------------------------------------------------------------------------
# SPPBottleneck forward
# ----------------------------------------------------------------------------
def spp_bottleneck(x_nchw, params, *, compute_dtype=jnp.bfloat16, tm=1024,
                   row_block=None):
    """SPPBottleneck forward (eval-mode BN folded).  x: NCHW float32."""
    N, Cin, H, W = x_nchw.shape
    hidden = params["w1"].shape[1]
    Cout = params["w2"].shape[1]
    n_branch = len(KERNEL_SIZES) + 1

    # Lane-pad channel dims to multiples of 128 (avoid masked vst.msk stores).
    # Padded channels are exact zeros end-to-end, so results are unchanged.
    Cin_p = _round_up(Cin, LANE)
    Ch_p = _round_up(hidden, LANE)
    Co_p = _round_up(Cout, LANE)

    # Eval-mode BN folding: per-channel scale into the 1x1 weights; bias in-kernel.
    w1f = params["w1"] * params["s1"][None, :]
    w2f = params["w2"] * params["s2"][None, :]
    w1f = _pad_axis(_pad_axis(w1f, 0, Cin_p), 1, Ch_p).astype(compute_dtype)
    b1 = _pad_axis(params["b1"], 0, Ch_p).reshape(1, Ch_p).astype(jnp.float32)
    w2_parts = [w2f[j * hidden:(j + 1) * hidden] for j in range(n_branch)]
    w2_parts = [_pad_axis(_pad_axis(p, 0, Ch_p), 1, Co_p).astype(compute_dtype)
                for p in w2_parts]
    b2 = _pad_axis(params["b2"], 0, Co_p).reshape(1, Co_p).astype(jnp.float32)

    # NCHW -> NHWC (channels on the lane axis).
    # TODO(synk): drop these boundary transposes if the surrounding model is NHWC.
    x = jnp.transpose(x_nchw, (0, 2, 3, 1))
    x2d = _pad_axis(x.reshape(N * H * W, Cin), 1, Cin_p).astype(compute_dtype)

    # conv1 (+BN+SiLU): x1 is the only HBM intermediate (bf16 by default).
    x1 = pw_conv_silu(x2d, w1f, b1, out_dtype=compute_dtype, tm=tm)
    x1 = x1.reshape(N, H, W, Ch_p)

    # fused SPP pools + conv2: the pooled branches / concat never touch HBM.
    out = fused_spp_conv2(x1, w2_parts, b2, out_dtype=jnp.float32,
                          row_block=row_block)
    out = out[..., :Cout]
    return jnp.transpose(out, (0, 3, 1, 2))                    # NHWC -> NCHW


# ----------------------------------------------------------------------------
# Deterministic parameter construction (synthetic; mirrors the module's shapes)
# ----------------------------------------------------------------------------
def make_params(in_channels, out_channels, key):
    hidden = in_channels // 2
    n_branch = len(KERNEL_SIZES) + 1
    conv2_in = hidden * n_branch
    k1, k2 = jax.random.split(key)
    eps = 1e-5

    def bn_fold(c, base):
        gamma = 1.0 + 0.10 * jnp.arange(c, dtype=jnp.float32) + base
        beta = 0.05 * jnp.arange(c, dtype=jnp.float32) - base
        mean = 0.01 * jnp.arange(c, dtype=jnp.float32)
        var = 1.0 + 0.02 * jnp.arange(c, dtype=jnp.float32)
        scale = gamma / jnp.sqrt(var + eps)
        bias = beta - mean * scale
        return scale, bias

    # weights stored as (Cin, Cout)  (PyTorch conv weight is (Cout, Cin, 1, 1))
    w1 = 0.3 * jax.random.normal(k1, (in_channels, hidden), dtype=jnp.float32)
    w2 = 0.3 * jax.random.normal(k2, (conv2_in, out_channels), dtype=jnp.float32)
    s1, b1 = bn_fold(hidden, 0.0)
    s2, b2 = bn_fold(out_channels, 0.1)
    return {"w1": w1, "s1": s1, "b1": b1, "w2": w2, "s2": s2, "b2": b2}


# ----------------------------------------------------------------------------
# Pure-JAX reference (NCHW, un-fused math) for validation
# ----------------------------------------------------------------------------
def ref_spp_bottleneck(x_nchw, params):
    def conv_bn_silu(x, w, scale, bias):
        y = jnp.einsum("nchw,co->nohw", x, w,
                       precision=jax.lax.Precision.HIGHEST)
        y = y * scale[None, :, None, None] + bias[None, :, None, None]
        return y * jax.nn.sigmoid(y)

    x1 = conv_bn_silu(x_nchw, params["w1"], params["s1"], params["b1"])
    feats = [x1]
    for ks in KERNEL_SIZES:
        p = ks // 2
        xp = jnp.pad(x1, ((0, 0), (0, 0), (p, p), (p, p)),
                     constant_values=-jnp.inf)
        pooled = jax.lax.reduce_window(
            xp, -jnp.inf, jax.lax.max, (1, 1, ks, ks), (1, 1, 1, 1), "VALID")
        feats.append(pooled)
    cat = jnp.concatenate(feats, axis=1)
    return conv_bn_silu(cat, params["w2"], params["s2"], params["b2"])


if __name__ == "__main__":
    key = jax.random.PRNGKey(0)
    kx, kp = jax.random.split(key)

    N, C, H, W = 2, 4, 24, 24
    out_channels = 4
    x = jax.random.normal(kx, (N, C, H, W), dtype=jnp.float32)
    params = make_params(C, out_channels, kp)
    ref = jax.block_until_ready(ref_spp_bottleneck(x, params))

    # f32 path with forced row blocking (3 row blocks -> exercises the first /
    # middle / last halo-DMA cases).  Exact SiLU, so tolerance is tight.
    out_f32 = jax.block_until_ready(
        spp_bottleneck(x, params, compute_dtype=jnp.float32, row_block=8))
    assert out_f32.shape == (N, out_channels, H, W), out_f32.shape
    np.testing.assert_allclose(np.asarray(out_f32), np.asarray(ref),
                               rtol=1e-2, atol=1e-2)

    # bf16 weights/activations (default) with automatic row-block selection
    # (whole image per batch element here) — loose smoke-test tolerance only.
    out_bf16 = jax.block_until_ready(spp_bottleneck(x, params))
    np.testing.assert_allclose(np.asarray(out_bf16), np.asarray(ref),
                               rtol=1e-1, atol=1e-1)

    print("KERNEL_OK")
</pallas_src>

<mosaic_0001>
module attributes {stable_mosaic.version = 11 : i64} {
  func.func @_pw_conv_kernel(%arg0: i32, %arg1: memref<1024x128xf32, #tpu.memory_space<vmem>>, %arg2: memref<128x128xf32, #tpu.memory_space<vmem>>, %arg3: memref<1x128xf32, #tpu.memory_space<vmem>>, %arg4: memref<1024x128xf32, #tpu.memory_space<vmem>>) attributes {dimension_semantics = [#tpu.dimension_semantics<parallel>], iteration_bounds = array<i64: 2>, scalar_prefetch = 0 : i64, scratch_operands = 0 : i64, tpu.core_type = #tpu.core_type<tc>, window_params = [{transform_indices = @transform_0, window_bounds = array<i64: 1024, 128>}, {pipeline_mode = #tpu.pipeline_mode<synchronous>, transform_indices = @transform_1, window_bounds = array<i64: 128, 128>}, {pipeline_mode = #tpu.pipeline_mode<synchronous>, transform_indices = @transform_2, window_bounds = array<i64: 1, 128>}, {transform_indices = @transform_3, window_bounds = array<i64: 1024, 128>}]} {
    %c0 = arith.constant 0 : index
    %c0_0 = arith.constant 0 : index
    %0 = vector.load %arg1[%c0, %c0_0] : memref<1024x128xf32, #tpu.memory_space<vmem>>, vector<1024x128xf32>
    %c0_1 = arith.constant 0 : index
    %c0_2 = arith.constant 0 : index
    %1 = vector.load %arg2[%c0_1, %c0_2] : memref<128x128xf32, #tpu.memory_space<vmem>>, vector<128x128xf32>
    %cst = arith.constant dense<0.000000e+00> : vector<1024x128xf32>
    %2 = tpu.matmul %0, %1, %cst {dimension_numbers = #tpu.dot_dimension_numbers<[1], [0], [0], [1], [0, 0, 1, 1], [], []>} : vector<1024x128xf32>, vector<128x128xf32>, vector<1024x128xf32> -> vector<1024x128xf32>
    %c0_3 = arith.constant 0 : index
    %c0_4 = arith.constant 0 : index
    %3 = vector.load %arg3[%c0_3, %c0_4] : memref<1x128xf32, #tpu.memory_space<vmem>>, vector<1x128xf32>
    %4 = vector.broadcast %3 : vector<1x128xf32> to vector<1024x128xf32>
    %5 = arith.addf %2, %4 : vector<1024x128xf32>
    %cst_5 = arith.constant 5.000000e-01 : f32
    %6 = vector.broadcast %cst_5 : f32 to vector<1024x128xf32>
    %7 = arith.mulf %6, %5 : vector<1024x128xf32>
    %cst_6 = arith.constant 5.000000e-01 : f32
    %8 = vector.broadcast %cst_6 : f32 to vector<1024x128xf32>
    %9 = arith.mulf %8, %5 : vector<1024x128xf32>
    %10 = math.tanh %9 : vector<1024x128xf32>
    %cst_7 = arith.constant 1.000000e+00 : f32
    %11 = vector.broadcast %cst_7 : f32 to vector<1024x128xf32>
    %12 = arith.addf %10, %11 : vector<1024x128xf32>
    %13 = arith.mulf %7, %12 : vector<1024x128xf32>
    %c0_8 = arith.constant 0 : index
    %c0_9 = arith.constant 0 : index
    %14 = vector.load %arg4[%c0_8, %c0_9] : memref<1024x128xf32, #tpu.memory_space<vmem>>, vector<1024x128xf32>
    tpu.vector_store %arg4[%c0_8, %c0_9], %13 {strides = array<i32>} : memref<1024x128xf32, #tpu.memory_space<vmem>>, vector<1024x128xf32>,
    return
  }
  func.func @transform_0(%arg0: i32) -> (i32, i32) {
    %c0_i32 = arith.constant 0 : i32
    %c0_i32_0 = arith.constant 0 : i32
    return %arg0, %c0_i32 : i32, i32
  }
  func.func @transform_1(%arg0: i32) -> (i32, i32) {
    %c0_i32 = arith.constant 0 : i32
    %c0_i32_0 = arith.constant 0 : i32
    %c0_i32_1 = arith.constant 0 : i32
    return %c0_i32, %c0_i32_0 : i32, i32
  }
  func.func @transform_2(%arg0: i32) -> (i32, i32) {
    %c0_i32 = arith.constant 0 : i32
    %c0_i32_0 = arith.constant 0 : i32
    %c0_i32_1 = arith.constant 0 : i32
    return %c0_i32, %c0_i32_0 : i32, i32
  }
  func.func @transform_3(%arg0: i32) -> (i32, i32) {
    %c0_i32 = arith.constant 0 : i32
    %c0_i32_0 = arith.constant 0 : i32
    return %arg0, %c0_i32 : i32, i32
  }
}

</mosaic_0001>

<bundles_post_ra>
// kernel: tpu_custom_call.1
= control target key start
LH: loop header
LB: loop body
LE: loop exit
PB: predicated region body
PF: predicated region fallthrough
CT: control target
= control target key end

     0   :  { %8 = vsyncpa [#allocation3], 0  ;;  %s4178_s0 = inlined_call_operand.hbm [shape: f32[1152,128], index: 0, kind: input, shape index: {}]   ;;  %s4179_s1 = inlined_call_operand.hbm [shape: f32[128,128], index: 1, kind: input, shape index: {}]   ;;  %s4180_s2 = inlined_call_operand.hbm [shape: f32[1,128], index: 2, kind: input, shape index: {}]   ;;  %s4181_s3 = inlined_call_operand.hbm [shape: f32[1152,128], index: 3, kind: output, shape index: {}]  }
   0x1   :  { %10 = vsyncpa [#allocation3 + $0x1], 0 }
   0x2   :  { %11 = vsyncpa [#allocation6], 0 }
   0x3   :  { %12 = vsyncpa [#allocation4], 0 }
   0x4   :  { %14 = vsyncpa [#allocation4 + $0x1], 0  ;;  %s2794_s12 = smov 0   ;;  %s2796_s13 = smov 0  }
   0x5   :  { %s2798_s14 = smov 0   ;;  %s2800_s15 = smov 0  }
   0x6 LB: > { %s2815_s16 = sadd.s32 4294967295, %s2762_s15   ;;  %s1840_s17 = sadd.s32 4294967294, %s2762_s15   ;;  %s2762_s15 = sphi %s2800_s15, %s4201_s15   ;;  %s2758_s14 = sphi %s2798_s14, %s4200_s14   ;;  %s2754_s13 = sphi %s2796_s13, %s4199_s13   ;;  %s2750_s12 = sphi %s2794_s12, %s4198_s12  }
   0x7   : > { %s2819_s18 = sadd.s32 1, %s2762_s15   ;;  %s27_s19 = sadd.s32 1, %s2758_s14 }
   0x8   : > { %s24_s20 = ssub.s32 %s2762_s15, %s2819_s18  ;;  %p34_p0 = scmp.ne.s32.totalorder %s2758_s14, %s2754_s13 }
   0x9   : > { %p25_p1 = scmp.eq.s32.totalorder %s24_s20, 0  ;;  %p35_p2 = scmp.eq.s32.totalorder %s2762_s15, 0 }
   0xa   : > { %p40_p3 = scmp.ne.s32.totalorder %s2754_s13, %s2750_s12  ;;  %p4182_p4 = scmp.eq.s32.totalorder %s2815_s16, 0 }
   0xb   : > { %s2831_s21 = scalar_select %p25_p1, %s2758_s14, %s27_s19  }
   0xc   : > { %p2833_p5 = por %p35_p2, %p34_p0  ;;  %p2839_p6 = por %p4182_p4, %p40_p3 }
   0xd   : > { %p106_p7 = scmp.eq.s32.totalorder %s2815_s16, 1  ;;  %p112_p8 = scmp.eq.s32.totalorder %s1840_s17, 1 }
   0xe   : > { %s4185_s22 = scalar_select %p2833_p5, 1, 0 }
   0xf   : > { %s4186_s23 = scalar_select %p2839_p6, 1, 0 }
  0x10   : > { %p1841_p9 = scmp.ge.s32.totalorder %s2762_s15, 1  ;;  %p119_p10 = scmp.lt.s32.totalorder %s2762_s15, 3 }
  0x11   : > { %p2846_p11 = por %p106_p7, %p34_p0  ;;  %p2850_p12 = por %p112_p8, %p40_p3 }
  0x12   : > { %p2854_p13 = pnand %p1841_p9, %p119_p10  ;;  %s2764_s27 = smov [#allocation5]  }
  0x13   : > { %s4187_s24 = scalar_select %p2846_p11, 1, 0 }
  0x14   : > { %s4188_s25 = scalar_select %p2850_p12, 1, 0 }
  0x15   : > { %s4189_s26 = scalar_select %p2854_p13, 1, 0 }
  0x16   : > { %p2295_p1 = pneg %p2854_p13  ;;  %s131_s28 = sshll.u32 %s2764_s27, 4  ;;  %s132_s28 = int_to_ptr.vmem [resolvable:$true] %s131_s28 }
  0x17   : > { %s2765_s30 = smov [#allocation7]   ;;  %s2608_s7 = scalar_lea.hbm %s4179_s1, 2048 }
  0x18   : > { %p2862_p2 = pnand %p2295_p1, %p4182_p4  ;;  %s145_s4 = sshll.u32 %s2765_s30, 4  ;;  %s2866_s4 = int_to_ptr.vmem [resolvable:$true] %s145_s4 }
  0x19   : > { %p2609_p0 = scmp.ne.s32.totalorder %s4179_s1, %s2608_s7  ;;  %p2615_p9 = scmp.lt.u32.totalorder %s2608_s7, %s4179_s1 }
  0x1a   : > { %p2610_p3 = pneg %p2862_p2 }
  0x1c   : > { %p2611_p7 = pnand %p2610_p3, %p2609_p0 }
  0x1e   : > { %p2612_p8 = pneg %p2611_p7 }
  0x20   : > { %p2617_p10 = pnand %p2615_p9, %p2612_p8 }
  0x22   : > { %2620 = shalt.err (!%p2617_p10)
}
  0x23   : > { %s2621_s17 = scalar_lea.vmem %s132_s28, 2048  ;;  %p2629_p11 = scmp.lt.s32.totalorder %s132_s28, %s132_s28 }
  0x24   : > { %p2622_p1 = scmp.ne.s32.totalorder %s132_s28, %s2621_s17  ;;  %p2630_p6 = scmp.lt.s32.totalorder %s2621_s17, %s2621_s17 }
  0x26   : > { %p2624_p4 = pnand %p2622_p1, %p2610_p3  ;;  %p2631_p13 = por %p2630_p6, %p2629_p11 }
  0x28   : > { %p2625_p12 = pneg %p2624_p4 }
  0x2a   : > { %p2632_p5 = pnand %p2631_p13, %p2625_p12 }
  0x2c   : > { %2635 = shalt.err (!%p2632_p5)
}
  0x2d   : > { %s2766_s19 = smov 128   ;;  %s2767_s20 = smov 8  }
  0x2e   : > { %2298 = dma.hbm_to_vmem [thread:$0]  (!%p2862_p2), %s4179_s1, 2048, %s132_s28, [#allocation6], %s2766_s19, %s2766_s19, %s2767_s20  }
  0x2f   : > { %s2636_s7 = scalar_lea.hbm %s4180_s2, 16 }
  0x30   : > { %p2637_p4 = scmp.ne.s32.totalorder %s4180_s2, %s2636_s7  ;;  %p2643_p11 = scmp.lt.u32.totalorder %s2636_s7, %s4180_s2 }
  0x32   : > { %p2639_p5 = pnand %p2637_p4, %p2610_p3 }
  0x34   : > { %p2640_p6 = pneg %p2639_p5 }
  0x36   : > { %p2645_p12 = pnand %p2643_p11, %p2640_p6 }
  0x38   : > { %2648 = shalt.err (!%p2645_p12)
}
  0x39   : > { %s2649_s28 = scalar_lea.vmem %s2866_s4, 16  ;;  %s2656_s17 = scalar_lea.vmem %s2866_s4, 32 }
  0x3a   : > { %p2650_p13 = scmp.ne.s32.totalorder %s2866_s4, %s2649_s28  ;;  %p2657_p8 = scmp.lt.s32.totalorder %s2866_s4, %s2866_s4 }
  0x3b   : > { %p2658_p9 = scmp.lt.s32.totalorder %s2656_s17, %s2649_s28 }
  0x3c   : > { %p2652_p0 = pnand %p2650_p13, %p2610_p3 }
  0x3d   : > { %p2659_p10 = por %p2658_p9, %p2657_p8 }
  0x3e   : > { %p2653_p7 = pneg %p2652_p0 }
  0x40   : > { %p2660_p1 = pnand %p2659_p10, %p2653_p7 }
  0x42   : > { %2663 = shalt.err (!%p2660_p1)
}
  0x43   : > { %2301 = dma.hbm_to_vmem [thread:$0]  (!%p2862_p2), %s4180_s2, 16, %s2866_s4, [#allocation6]  }
  0x44   : > { %p1844_p4 = scmp.ge.s32.totalorder %s2762_s15, 2 }
  0x45   : > { %p4191_p3 = scmp.ne.s32.totalorder (!%p1844_p4), %s4185_s22, 0 }
  0x46   : > { %152 = sbr.rel (%p1844_p4) target bundleno = 112 (0x70), region = 24 }
  0x4d   : > { %155 = sbr.rel (!%p4191_p3) target bundleno = 112 (0x70), region = 28  ;;  %s156_s27 = sand.u32 (%p4191_p3), 1, %s2758_s14  }
  0x4e   : > { %s1846_s30 = sshll.u32 (%p4191_p3), %s2762_s15, 7  ;;  %s1845_s5 = sshll.u32 (%p4191_p3), %s156_s27, 10 }
  0x4f   : > { %s162_s6 = ssub.s32 (%p4191_p3), 144, %s1846_s30  ;;  %s2926_s7 = scalar_lea.sflag (%p4191_p3), [#allocation3], %s156_s27 }
  0x50   : > { %p163_p5 = scmp.lt.s32.totalorder (%p4191_p3), %s162_s6, 128  ;;  %s160_s8 = scalar_lea.vmem (%p4191_p3), [#allocation2], %s1845_s5 }
  0x54   : > { %s4203_s6 = smov (!%p163_p5, %s162_s6), 128 }
  0x55   : > { %s2923_s29 = sshll.u32 %s4203_s6, 7 }
  0x56   : > { %s167_s4 = ssub.s32 16384, %s2923_s29 }
  0x57   : > { %168 = vsyncadd %s2926_s7, %s167_s4  ;;  %p1848_p2 = scmp.ne.s32.totalorder %s2923_s29, 0  ;;  %s1867_s22 = sshll.u32 %s2762_s15, 14 }
  0x58   : > { %s2934_s11 = scalar_lea.hbm %s4178_s0, %s1867_s22  ;;  %s173_s28 = sshll.u32 %s160_s8, 4  ;;  %s2936_s28 = int_to_ptr.vmem [resolvable:$true] %s173_s28 }
  0x59   : > { %s2664_s17 = scalar_lea.hbm %s2934_s11, %s2923_s29  ;;  %s2668_s27 = scalar_lea.hbm %s4178_s0, 18432 }
  0x5a   : > { %p2665_p6 = scmp.ne.s32.totalorder %s2934_s11, %s2664_s17  ;;  %p2669_p13 = scmp.lt.u32.totalorder %s2934_s11, %s4178_s0 }
  0x5b   : > { %p2670_p0 = scmp.lt.u32.totalorder %s2668_s27, %s2664_s17  ;;  %p2672_p8 = scmp.lt.u32.totalorder %s2664_s17, %s2934_s11 }
  0x5c   : > { %p2666_p11 = pnand %p2665_p6, %p1848_p2 }
  0x5d   : > { %p2671_p7 = por %p2670_p0, %p2669_p13 }
  0x5e   : > { %p2667_p12 = pneg %p2666_p11 }
  0x5f   : > { %p2673_p9 = por %p2672_p8, %p2671_p7 }
  0x61   : > { %p2674_p10 = pnand %p2673_p9, %p2667_p12 }
  0x63   : > { %2677 = shalt.err (!%p2674_p10)
}
  0x64   : > { %s2678_s6 = scalar_lea.vmem %s2936_s28, %s2923_s29  ;;  %s2768_s4 = smov [#allocation2]  }
  0x65   : > { %p2679_p1 = scmp.ne.s32.totalorder %s2936_s28, %s2678_s6  ;;  %s2682_s8 = sshll.u32 %s2768_s4, 4  ;;  %s2683_s8 = int_to_ptr.vmem [resolvable:$false] %s2682_s8 }
  0x66   : > { %s2684_s22 = scalar_lea.vmem %s2683_s8, 32768  ;;  %p2685_p6 = scmp.lt.s32.totalorder %s2936_s28, %s2683_s8 }
  0x67   : > { %p2680_p3 = pnand %p2679_p1, %p1848_p2  ;;  %p2686_p11 = scmp.lt.s32.totalorder %s2684_s22, %s2678_s6 }
  0x69   : > { %p2681_p5 = pneg %p2680_p3  ;;  %p2687_p13 = por %p2686_p11, %p2685_p6 }
  0x6b   : > { %p2688_p0 = pnand %p2687_p13, %p2681_p5 }
  0x6d   : > { %2691 = shalt.err (!%p2688_p0)
}
  0x6e   : > { %s2769_s9 = smov 128   ;;  %s2770_s10 = smov 8  }
  0x6f   : > { %179 = dma.hbm_to_vmem [thread:$0]  (%p1848_p2), %s2934_s11, %s2923_s29, %s2936_s28, %s2926_s7, %s2769_s9, %s2769_s9, %s2770_s10  }
  0x70 PF: > { %p4192_p12 = scmp.ne.s32.totalorder %s4189_s26, 0 }
  0x71   : > { %s2966_s17 = sand.u32 (!%p4192_p12), 1, %s2754_s13   ;;  %p4193_p7 = scmp.ne.s32.totalorder (!%p4192_p12), %s4186_s23, 0 }
  0x72   : > { %185 = sbr.rel (%p4192_p12) target bundleno = 576 (0x240), region = 32  ;;  %s1853_s19 = sshll.u32 (!%p4192_p12), %s2966_s17, 10 }
  0x73   : > { %s188_s20 = scalar_lea.sflag (!%p4192_p12), [#allocation3], %s2966_s17  ;;  %s2972_s27 = scalar_lea.vmem (!%p4192_p12), [#allocation2], %s1853_s19 }
  0x79   : > { %2737 = dma.done.wait (%p4193_p7), %s188_s20, 16384  }
  0x7a   : > { %2739 = vsyncadd (%p4193_p7), %s188_s20, 4294950912  ;;  %p4194_p2 = scmp.eq.s32.totalorder %s2815_s16, 0 }
  0x7c   : > { %2741 = dma.done.wait (%p4194_p2), [#allocation6], 2064   ;;  %p4195_p8 = pmov %p4194_p2 }
  0x7d   : > { %v360_v0 = vld [vmem:[#allocation5] sm:$0xff]  ;;  %v361_v1 = vld [vmem:[#allocation5 + $0x8] sm:$0xff]  ;;  %v362_v2 = vld [vmem:[#allocation5 + $0x10] sm:$0xff]  ;;  %s3184_s23 = scalar_lea.vmem [#allocation8], %s1853_s19  ;;  %s1729_s26 = scalar_lea.sflag [#allocation4], %s2966_s17 }
  0x7e   : > { %2743 = vsyncadd (%p4195_p8), [#allocation6], 4294965232  ;;  %v2237_v3 = vpack.c.bf16 %v361_v1, %v360_v0  ;;  %v363_v4 = vld [vmem:[#allocation5 + $0x18] sm:$0xff]  ;;  %v364_v6 = vld [vmem:[#allocation5 + $0x20] sm:$0xff]  ;;  %p4196_p9 = scmp.ne.s32.totalorder %s4187_s24, 0 }
  0x7f   : > { %v2241_v5 = vpack.c.bf16 %v363_v4, %v362_v2  ;;  %v365_v7 = vld [vmem:[#allocation5 + $0x28] sm:$0xff]  ;;  %v232_v9 = vld [vmem:[%s2972_s27] sm:$0xff]  ;;  %v366_v11 = vld [vmem:[#allocation5 + $0x30] sm:$0xff]  ;;  %s1859_s29 = sshll.u32 (%p4196_p9), %s2815_s16, 7 }
  0x80   : > { %2238 = vmatprep.subr.bf16.mxu0 %v2237_v3  ;;  %2269 = vmatprep.subr.bf16.mxu1 %v2237_v3  ;;  %v2245_v8 = vpack.c.bf16 %v365_v7, %v364_v6  ;;  %v296_v10 = vld [vmem:[%s2972_s27 + $0x200] sm:$0xff]  ;;  %v367_v12 = vld [vmem:[#allocation5 + $0x38] sm:$0xff]  ;;  %v369_v15 = vld [vmem:[#allocation5 + $0x48] sm:$0xff]  ;;  %s1737_s7 = ssub.s32 (%p4196_p9), 144, %s1859_s29 }
  0x81   : > { %2240 = vmatpush3.bf16.msra.mxu0 %v2237_v3  ;;  %2277 = vmatpush3.bf16.msra.mxu1 %v2237_v3  ;;  %v2249_v13 = vpack.c.bf16 %v367_v12, %v366_v11  ;;  %v368_v14 = vld [vmem:[#allocation5 + $0x40] sm:$0xff]  ;;  %v370_v17 = vld [vmem:[#allocation5 + $0x50] sm:$0xff]  ;;  %v371_v18 = vld [vmem:[#allocation5 + $0x58] sm:$0xff]  ;;  %p1738_p10 = scmp.lt.s32.totalorder (%p4196_p9), %s1737_s7, 128 }
  0x82   : > { %2242 = vmatprep.subr.bf16.mxu0 %v2241_v5  ;;  %2270 = vmatprep.subr.bf16.mxu1 %v2241_v5  ;;  %v2253_v16 = vpack.c.bf16 %v369_v15, %v368_v14  ;;  %v2257_v19 = vpack.c.bf16 %v371_v18, %v370_v17  ;;  %v372_v20 = vld [vmem:[#allocation5 + $0x60] sm:$0xff]  ;;  %v373_v21 = vld [vmem:[#allocation5 + $0x68] sm:$0xff]  ;;  %v374_v23 = vld [vmem:[#allocation5 + $0x70] sm:$0xff] }
  0x83   : > { %2045 = vmatprep.mubr.f32.mxu0 %v232_v9  ;;  %2141 = vmatprep.mubr.f32.mxu1 %v296_v10  ;;  %v2261_v22 = vpack.c.bf16 %v373_v21, %v372_v20  ;;  %v375_v24 = vld [vmem:[#allocation5 + $0x78] sm:$0xff]  ;;  %v233_v26 = vld [vmem:[%s2972_s27 + $0x8] sm:$0xff]  ;;  %v234_v28 = vld [vmem:[%s2972_s27 + $0x10] sm:$0xff] }
  0x84   : > { %v2265_v25 = vpack.c.bf16 %v375_v24, %v374_v23  ;;  %v297_v27 = vld [vmem:[%s2972_s27 + $0x208] sm:$0xff]  ;;  %v298_v29 = vld [vmem:[%s2972_s27 + $0x210] sm:$0xff]  ;;  %v235_v30 = vld [vmem:[%s2972_s27 + $0x18] sm:$0xff] }
  0x85   : > { %2244 = vmatpush3.bf16.msra.mxu0 %v2241_v5  ;;  %2278 = vmatpush3.bf16.msra.mxu1 %v2241_v5  ;;  %v299_v31 = vld [vmem:[%s2972_s27 + $0x218] sm:$0xff]  ;;  %v236_v32 = vld [vmem:[%s2972_s27 + $0x20] sm:$0xff]  ;;  %v237_v34 = vld [vmem:[%s2972_s27 + $0x28] sm:$0xff] }
  0x86   : > { %2246 = vmatprep.subr.bf16.mxu0 %v2245_v8  ;;  %2271 = vmatprep.subr.bf16.mxu1 %v2245_v8  ;;  %v300_v33 = vld [vmem:[%s2972_s27 + $0x220] sm:$0xff]  ;;  %v301_v35 = vld [vmem:[%s2972_s27 + $0x228] sm:$0xff]  ;;  %v238_v36 = vld [vmem:[%s2972_s27 + $0x30] sm:$0xff] }
  0x87   : > { %v302_v37 = vld [vmem:[%s2972_s27 + $0x230] sm:$0xff]  ;;  %v239_v38 = vld [vmem:[%s2972_s27 + $0x38] sm:$0xff]  ;;  %v240_v40 = vld [vmem:[%s2972_s27 + $0x40] sm:$0xff] }
  0x88   : > { %v303_v39 = vld [vmem:[%s2972_s27 + $0x238] sm:$0xff]  ;;  %v304_v41 = vld [vmem:[%s2972_s27 + $0x240] sm:$0xff]  ;;  %v241_v42 = vld [vmem:[%s2972_s27 + $0x48] sm:$0xff] }
  0x89   : > { %2248 = vmatpush3.bf16.msra.mxu0 %v2245_v8  ;;  %2279 = vmatpush3.bf16.msra.mxu1 %v2245_v8  ;;  %v305_v43 = vld [vmem:[%s2972_s27 + $0x248] sm:$0xff]  ;;  %v242_v44 = vld [vmem:[%s2972_s27 + $0x50] sm:$0xff]  ;;  %v243_v46 = vld [vmem:[%s2972_s27 + $0x58] sm:$0xff] }
  0x8a   : > { %2250 = vmatprep.subr.bf16.mxu0 %v2249_v13  ;;  %2272 = vmatprep.subr.bf16.mxu1 %v2249_v13  ;;  %v306_v45 = vld [vmem:[%s2972_s27 + $0x250] sm:$0xff]  ;;  %v307_v47 = vld [vmem:[%s2972_s27 + $0x258] sm:$0xff]  ;;  %v244_v48 = vld [vmem:[%s2972_s27 + $0x60] sm:$0xff] }
  0x8b   : > { %v308_v49 = vld [vmem:[%s2972_s27 + $0x260] sm:$0xff]  ;;  %v245_v50 = vld [vmem:[%s2972_s27 + $0x68] sm:$0xff]  ;;  %v246_v52 = vld [vmem:[%s2972_s27 + $0x70] sm:$0xff] }
  0x8c   : > { %v309_v51 = vld [vmem:[%s2972_s27 + $0x268] sm:$0xff]  ;;  %v310_v53 = vld [vmem:[%s2972_s27 + $0x270] sm:$0xff]  ;;  %v247_v54 = vld [vmem:[%s2972_s27 + $0x78] sm:$0xff] }
  0x8d   : > { %2252 = vmatpush3.bf16.msra.mxu0 %v2249_v13  ;;  %2280 = vmatpush3.bf16.msra.mxu1 %v2249_v13  ;;  %v311_v55 = vld [vmem:[%s2972_s27 + $0x278] sm:$0xff]  ;;  %v248_v56 = vld [vmem:[%s2972_s27 + $0x80] sm:$0xff]  ;;  %v249_v58 = vld [vmem:[%s2972_s27 + $0x88] sm:$0xff] }
  0x8e   : > { %2254 = vmatprep.subr.bf16.mxu0 %v2253_v16  ;;  %2273 = vmatprep.subr.bf16.mxu1 %v2253_v16  ;;  %v312_v57 = vld [vmem:[%s2972_s27 + $0x280] sm:$0xff]  ;;  %v313_v59 = vld [vmem:[%s2972_s27 + $0x288] sm:$0xff]  ;;  %v250_v60 = vld [vmem:[%s2972_s27 + $0x90] sm:$0xff] }
  0x8f   : > { %v314_v61 = vld [vmem:[%s2972_s27 + $0x290] sm:$0xff]  ;;  %v251_v62 = vld [vmem:[%s2972_s27 + $0x98] sm:$0xff]  ;;  %v252_v0 = vld [vmem:[%s2972_s27 + $0xa0] sm:$0xff] }
  0x90   : > { %v315_v63 = vld [vmem:[%s2972_s27 + $0x298] sm:$0xff]  ;;  %v316_v1 = vld [vmem:[%s2972_s27 + $0x2a0] sm:$0xff]  ;;  %v253_v2 = vld [vmem:[%s2972_s27 + $0xa8] sm:$0xff] }
  0x91   : > { %2256 = vmatpush3.bf16.msra.mxu0 %v2253_v16  ;;  %2281 = vmatpush3.bf16.msra.mxu1 %v2253_v16  ;;  %v317_v3 = vld [vmem:[%s2972_s27 + $0x2a8] sm:$0xff]  ;;  %v254_v4 = vld [vmem:[%s2972_s27 + $0xb0] sm:$0xff]  ;;  %v255_v6 = vld [vmem:[%s2972_s27 + $0xb8] sm:$0xff] }
  0x92   : > { %2258 = vmatprep.subr.bf16.mxu0 %v2257_v19  ;;  %2274 = vmatprep.subr.bf16.mxu1 %v2257_v19  ;;  %v318_v5 = vld [vmem:[%s2972_s27 + $0x2b0] sm:$0xff]  ;;  %v319_v7 = vld [vmem:[%s2972_s27 + $0x2b8] sm:$0xff]  ;;  %v256_v8 = vld [vmem:[%s2972_s27 + $0xc0] sm:$0xff] }
  0x93   : > { %v320_v9 = vld [vmem:[%s2972_s27 + $0x2c0] sm:$0xff]  ;;  %v257_v10 = vld [vmem:[%s2972_s27 + $0xc8] sm:$0xff]  ;;  %v258_v12 = vld [vmem:[%s2972_s27 + $0xd0] sm:$0xff] }
  0x94   : > { %v321_v11 = vld [vmem:[%s2972_s27 + $0x2c8] sm:$0xff]  ;;  %v322_v13 = vld [vmem:[%s2972_s27 + $0x2d0] sm:$0xff]  ;;  %v259_v14 = vld [vmem:[%s2972_s27 + $0xd8] sm:$0xff] }
  0x95   : > { %2260 = vmatpush3.bf16.msra.mxu0 %v2257_v19  ;;  %2282 = vmatpush3.bf16.msra.mxu1 %v2257_v19  ;;  %v323_v15 = vld [vmem:[%s2972_s27 + $0x2d8] sm:$0xff]  ;;  %v260_v16 = vld [vmem:[%s2972_s27 + $0xe0] sm:$0xff]  ;;  %v261_v18 = vld [vmem:[%s2972_s27 + $0xe8] sm:$0xff] }
  0x96   : > { %2262 = vmatprep.subr.bf16.mxu0 %v2261_v22  ;;  %2275 = vmatprep.subr.bf16.mxu1 %v2261_v22  ;;  %v324_v17 = vld [vmem:[%s2972_s27 + $0x2e0] sm:$0xff]  ;;  %v325_v19 = vld [vmem:[%s2972_s27 + $0x2e8] sm:$0xff]  ;;  %v262_v20 = vld [vmem:[%s2972_s27 + $0xf0] sm:$0xff] }
  0x97   : > { %v326_v21 = vld [vmem:[%s2972_s27 + $0x2f0] sm:$0xff]  ;;  %v327_v23 = vld [vmem:[%s2972_s27 + $0x2f8] sm:$0xff]  ;;  %v264_v24 = vld [vmem:[%s2972_s27 + $0x100] sm:$0xff] }
  0x99   : > { %2264 = vmatpush3.bf16.msra.mxu0 %v2261_v22  ;;  %2283 = vmatpush3.bf16.msra.mxu1 %v2261_v22  ;;  %v263_v22 = vld [vmem:[%s2972_s27 + $0xf8] sm:$0xff] }
  0x9a   : > { %2266 = vmatprep.subr.bf16.mxu0 %v2265_v25  ;;  %2276 = vmatprep.subr.bf16.mxu1 %v2265_v25 }
  0x9d   : > { %2268 = vmatpush3.bf16.msra.mxu0 %v2265_v25  ;;  %2284 = vmatpush3.bf16.msra.mxu1 %v2265_v25  ;;  %v328_v25 = vld [vmem:[%s2972_s27 + $0x300] sm:$0xff] }
  0xa0   : > { %2046 = vmatmul.mubr.f32.vlgmr.msra.gmra.mrb[0].mxu0 %v233_v26  ;;  %2142 = vmatmul.mubr.f32.vlgmr.msra.gmra.mrb[0].mxu1 %v297_v27  ;;  %v265_v26 = vld [vmem:[%s2972_s27 + $0x108] sm:$0xff] }
  0xa1   : > { %2048 = vmatprep.mubr.f32.mxu0 %v234_v28  ;;  %2144 = vmatprep.mubr.f32.mxu1 %v298_v29  ;;  %v329_v27 = vld [vmem:[%s2972_s27 + $0x308] sm:$0xff]  ;;  %v266_v28 = vld [vmem:[%s2972_s27 + $0x110] sm:$0xff] }
  0xa2   : > { %v330_v29 = vld [vmem:[%s2972_s27 + $0x310] sm:$0xff] }
  0xa4   : > { %2049 = vmatmul.mubr.f32.gmra.mrb[2].mxu0 %v235_v30  ;;  %2145 = vmatmul.mubr.f32.gmra.mrb[2].mxu1 %v299_v31  ;;  %v267_v30 = vld [vmem:[%s2972_s27 + $0x118] sm:$0xff] }
  0xa5   : > { %2051 = vmatprep.mubr.f32.mxu0 %v236_v32  ;;  %2147 = vmatprep.mubr.f32.mxu1 %v300_v33  ;;  %v331_v31 = vld [vmem:[%s2972_s27 + $0x318] sm:$0xff]  ;;  %v268_v32 = vld [vmem:[%s2972_s27 + $0x120] sm:$0xff] }
  0xa6   : > { %v332_v33 = vld [vmem:[%s2972_s27 + $0x320] sm:$0xff] }
  0xa8   : > { %2052 = vmatmul.mubr.f32.gmra.mrb[4].mxu0 %v237_v34  ;;  %2148 = vmatmul.mubr.f32.gmra.mrb[4].mxu1 %v301_v35  ;;  %v269_v34 = vld [vmem:[%s2972_s27 + $0x128] sm:$0xff] }
  0xa9   : > { %2054 = vmatprep.mubr.f32.mxu0 %v238_v36  ;;  %2150 = vmatprep.mubr.f32.mxu1 %v302_v37  ;;  %v333_v35 = vld [vmem:[%s2972_s27 + $0x328] sm:$0xff]  ;;  %v270_v36 = vld [vmem:[%s2972_s27 + $0x130] sm:$0xff] }
  0xaa   : > { %v334_v37 = vld [vmem:[%s2972_s27 + $0x330] sm:$0xff] }
  0xac   : > { %2055 = vmatmul.mubr.f32.gmra.mrb[6].mxu0 %v239_v38  ;;  %2151 = vmatmul.mubr.f32.gmra.mrb[6].mxu1 %v303_v39  ;;  %v271_v38 = vld [vmem:[%s2972_s27 + $0x138] sm:$0xff] }
  0xad   : > { %2057 = vmatprep.mubr.f32.mxu0 %v240_v40  ;;  %2153 = vmatprep.mubr.f32.mxu1 %v304_v41  ;;  %v335_v39 = vld [vmem:[%s2972_s27 + $0x338] sm:$0xff]  ;;  %v272_v40 = vld [vmem:[%s2972_s27 + $0x140] sm:$0xff] }
  0xae   : > { %v336_v41 = vld [vmem:[%s2972_s27 + $0x340] sm:$0xff] }
  0xb0   : > { %2058 = vmatmul.mubr.f32.gmra.mrb[8].mxu0 %v241_v42  ;;  %2154 = vmatmul.mubr.f32.gmra.mrb[8].mxu1 %v305_v43  ;;  %v273_v42 = vld [vmem:[%s2972_s27 + $0x148] sm:$0xff] }
  0xb1   : > { %2060 = vmatprep.mubr.f32.mxu0 %v242_v44  ;;  %2156 = vmatprep.mubr.f32.mxu1 %v306_v45  ;;  %v337_v43 = vld [vmem:[%s2972_s27 + $0x348] sm:$0xff]  ;;  %v274_v44 = vld [vmem:[%s2972_s27 + $0x150] sm:$0xff] }
  0xb2   : > { %v338_v45 = vld [vmem:[%s2972_s27 + $0x350] sm:$0xff] }
  0xb4   : > { %2061 = vmatmul.mubr.f32.gmra.mrb[10].mxu0 %v243_v46  ;;  %2157 = vmatmul.mubr.f32.gmra.mrb[10].mxu1 %v307_v47  ;;  %v275_v46 = vld [vmem:[%s2972_s27 + $0x158] sm:$0xff] }
  0xb5   : > { %2063 = vmatprep.mubr.f32.mxu0 %v244_v48  ;;  %2159 = vmatprep.mubr.f32.mxu1 %v308_v49  ;;  %v339_v47 = vld [vmem:[%s2972_s27 + $0x358] sm:$0xff]  ;;  %v276_v48 = vld [vmem:[%s2972_s27 + $0x160] sm:$0xff] }
  0xb6   : > { %v340_v49 = vld [vmem:[%s2972_s27 + $0x360] sm:$0xff] }
  0xb8   : > { %2064 = vmatmul.mubr.f32.gmra.mrb[12].mxu0 %v245_v50  ;;  %2160 = vmatmul.mubr.f32.gmra.mrb[12].mxu1 %v309_v51  ;;  %v277_v50 = vld [vmem:[%s2972_s27 + $0x168] sm:$0xff] }
  0xb9   : > { %2066 = vmatprep.mubr.f32.mxu0 %v246_v52  ;;  %2162 = vmatprep.mubr.f32.mxu1 %v310_v53  ;;  %v341_v51 = vld [vmem:[%s2972_s27 + $0x368] sm:$0xff]  ;;  %v278_v52 = vld [vmem:[%s2972_s27 + $0x170] sm:$0xff] }
  0xba   : > { %v342_v53 = vld [vmem:[%s2972_s27 + $0x370] sm:$0xff] }
  0xbc   : > { %2067 = vmatmul.mubr.f32.gmra.mrb[14].mxu0 %v247_v54  ;;  %2163 = vmatmul.mubr.f32.gmra.mrb[14].mxu1 %v311_v55  ;;  %v279_v54 = vld [vmem:[%s2972_s27 + $0x178] sm:$0xff] }
  0xbd   : > { %2069 = vmatprep.mubr.f32.mxu0 %v248_v56  ;;  %2165 = vmatprep.mubr.f32.mxu1 %v312_v57  ;;  %v343_v55 = vld [vmem:[%s2972_s27 + $0x378] sm:$0xff]  ;;  %v280_v56 = vld [vmem:[%s2972_s27 + $0x180] sm:$0xff] }
  0xbe   : > { %v344_v57 = vld [vmem:[%s2972_s27 + $0x380] sm:$0xff] }
  0xc0   : > { %2070 = vmatmul.mubr.f32.gmra.mrb[16].mxu0 %v249_v58  ;;  %2166 = vmatmul.mubr.f32.gmra.mrb[16].mxu1 %v313_v59  ;;  %v281_v58 = vld [vmem:[%s2972_s27 + $0x188] sm:$0xff] }
  0xc1   : > { %2072 = vmatprep.mubr.f32.mxu0 %v250_v60  ;;  %2168 = vmatprep.mubr.f32.mxu1 %v314_v61  ;;  %v345_v59 = vld [vmem:[%s2972_s27 + $0x388] sm:$0xff]  ;;  %v282_v60 = vld [vmem:[%s2972_s27 + $0x190] sm:$0xff] }
  0xc2   : > { %v346_v61 = vld [vmem:[%s2972_s27 + $0x390] sm:$0xff] }
  0xc4   : > { %2073 = vmatmul.mubr.f32.gmra.mrb[18].mxu0 %v251_v62  ;;  %2169 = vmatmul.mubr.f32.gmra.mrb[18].mxu1 %v315_v63  ;;  %v283_v62 = vld [vmem:[%s2972_s27 + $0x198] sm:$0xff] }
  0xc5   : > { %2075 = vmatprep.mubr.f32.mxu0 %v252_v0  ;;  %2171 = vmatprep.mubr.f32.mxu1 %v316_v1  ;;  %v347_v63 = vld [vmem:[%s2972_s27 + $0x398] sm:$0xff]  ;;  %v284_v0 = vld [vmem:[%s2972_s27 + $0x1a0] sm:$0xff] }
  0xc6   : > { %v348_v1 = vld [vmem:[%s2972_s27 + $0x3a0] sm:$0xff] }
  0xc8   : > { %2076 = vmatmul.mubr.f32.gmra.mrb[20].mxu0 %v253_v2  ;;  %2172 = vmatmul.mubr.f32.gmra.mrb[20].mxu1 %v317_v3  ;;  %v285_v2 = vld [vmem:[%s2972_s27 + $0x1a8] sm:$0xff] }
  0xc9   : > { %2078 = vmatprep.mubr.f32.mxu0 %v254_v4  ;;  %2174 = vmatprep.mubr.f32.mxu1 %v318_v5  ;;  %v349_v3 = vld [vmem:[%s2972_s27 + $0x3a8] sm:$0xff]  ;;  %v286_v4 = vld [vmem:[%s2972_s27 + $0x1b0] sm:$0xff] }
  0xca   : > { %v350_v5 = vld [vmem:[%s2972_s27 + $0x3b0] sm:$0xff] }
  0xcc   : > { %2079 = vmatmul.mubr.f32.gmra.mrb[22].mxu0 %v255_v6  ;;  %2175 = vmatmul.mubr.f32.gmra.mrb[22].mxu1 %v319_v7  ;;  %v287_v6 = vld [vmem:[%s2972_s27 + $0x1b8] sm:$0xff] }
  0xcd   : > { %2081 = vmatprep.mubr.f32.mxu0 %v256_v8  ;;  %2177 = vmatprep.mubr.f32.mxu1 %v320_v9  ;;  %v351_v7 = vld [vmem:[%s2972_s27 + $0x3b8] sm:$0xff]  ;;  %v288_v8 = vld [vmem:[%s2972_s27 + $0x1c0] sm:$0xff] }
  0xce   : > { %v352_v9 = vld [vmem:[%s2972_s27 + $0x3c0] sm:$0xff] }
  0xd0   : > { %2082 = vmatmul.mubr.f32.gmra.mrb[24].mxu0 %v257_v10  ;;  %2178 = vmatmul.mubr.f32.gmra.mrb[24].mxu1 %v321_v11  ;;  %v289_v10 = vld [vmem:[%s2972_s27 + $0x1c8] sm:$0xff] }
  0xd1   : > { %2084 = vmatprep.mubr.f32.mxu0 %v258_v12  ;;  %2180 = vmatprep.mubr.f32.mxu1 %v322_v13  ;;  %v353_v11 = vld [vmem:[%s2972_s27 + $0x3c8] sm:$0xff]  ;;  %v290_v12 = vld [vmem:[%s2972_s27 + $0x1d0] sm:$0xff] }
  0xd2   : > { %v354_v13 = vld [vmem:[%s2972_s27 + $0x3d0] sm:$0xff] }
  0xd4   : > { %2085 = vmatmul.mubr.f32.gmra.mrb[26].mxu0 %v259_v14  ;;  %2181 = vmatmul.mubr.f32.gmra.mrb[26].mxu1 %v323_v15  ;;  %v291_v14 = vld [vmem:[%s2972_s27 + $0x1d8] sm:$0xff] }
  0xd5   : > { %2087 = vmatprep.mubr.f32.mxu0 %v260_v16  ;;  %2183 = vmatprep.mubr.f32.mxu1 %v324_v17  ;;  %v355_v15 = vld [vmem:[%s2972_s27 + $0x3d8] sm:$0xff]  ;;  %v292_v16 = vld [vmem:[%s2972_s27 + $0x1e0] sm:$0xff] }
  0xd6   : > { %v356_v17 = vld [vmem:[%s2972_s27 + $0x3e0] sm:$0xff] }
  0xd8   : > { %2088 = vmatmul.mubr.f32.gmra.mrb[28].mxu0 %v261_v18  ;;  %2184 = vmatmul.mubr.f32.gmra.mrb[28].mxu1 %v325_v19  ;;  %v293_v18 = vld [vmem:[%s2972_s27 + $0x1e8] sm:$0xff] }
  0xd9   : > { %2090 = vmatprep.mubr.f32.mxu0 %v262_v20  ;;  %2186 = vmatprep.mubr.f32.mxu1 %v326_v21  ;;  %v357_v19 = vld [vmem:[%s2972_s27 + $0x3e8] sm:$0xff]  ;;  %v294_v20 = vld [vmem:[%s2972_s27 + $0x1f0] sm:$0xff] }
  0xda   : > { %v358_v21 = vld [vmem:[%s2972_s27 + $0x3f0] sm:$0xff] }
  0xdc   : > { %2091 = vmatmul.mubr.f32.gmra.mrb[30].mxu0 %v263_v22  ;;  %2187 = vmatmul.mubr.f32.gmra.mrb[30].mxu1 %v327_v23  ;;  %v295_v22 = vld [vmem:[%s2972_s27 + $0x1f8] sm:$0xff] }
  0xdd   : > { %2093 = vmatprep.mubr.f32.mxu0 %v264_v24  ;;  %2189 = vmatprep.mubr.f32.mxu1 %v328_v25  ;;  %v359_v23 = vld [vmem:[%s2972_s27 + $0x3f8] sm:$0xff]  ;;  %v3110_v24 = vld [vmem:[#allocation7] ss:$0 sm:$0xff] }
  0xe0   : > { %2094 = vmatmul.mubr.f32.gmra.mrb[32].mxu0 %v265_v26  ;;  %2190 = vmatmul.mubr.f32.gmra.mrb[32].mxu1 %v329_v27 }
  0xe1   : > { %2096 = vmatprep.mubr.f32.mxu0 %v266_v28  ;;  %2192 = vmatprep.mubr.f32.mxu1 %v330_v29 }
  0xe4   : > { %2097 = vmatmul.mubr.f32.gmra.mrb[34].mxu0 %v267_v30  ;;  %2193 = vmatmul.mubr.f32.gmra.mrb[34].mxu1 %v331_v31 }
  0xe5   : > { %2099 = vmatprep.mubr.f32.mxu0 %v268_v32  ;;  %2195 = vmatprep.mubr.f32.mxu1 %v332_v33 }
  0xe8   : > { %2100 = vmatmul.mubr.f32.gmra.mrb[36].mxu0 %v269_v34  ;;  %2196 = vmatmul.mubr.f32.gmra.mrb[36].mxu1 %v333_v35 }
  0xe9   : > { %2102 = vmatprep.mubr.f32.mxu0 %v270_v36  ;;  %2198 = vmatprep.mubr.f32.mxu1 %v334_v37 }
  0xec   : > { %2103 = vmatmul.mubr.f32.gmra.mrb[38].mxu0 %v271_v38  ;;  %2199 = vmatmul.mubr.f32.gmra.mrb[38].mxu1 %v335_v39 }
  0xed   : > { %2105 = vmatprep.mubr.f32.mxu0 %v272_v40  ;;  %2201 = vmatprep.mubr.f32.mxu1 %v336_v41 }
  0xf0   : > { %2106 = vmatmul.mubr.f32.gmra.mrb[40].mxu0 %v273_v42  ;;  %2202 = vmatmul.mubr.f32.gmra.mrb[40].mxu1 %v337_v43 }
  0xf1   : > { %2108 = vmatprep.mubr.f32.mxu0 %v274_v44  ;;  %2204 = vmatprep.mubr.f32.mxu1 %v338_v45 }
  0xf4   : > { %2109 = vmatmul.mubr.f32.gmra.mrb[42].mxu0 %v275_v46  ;;  %2205 = vmatmul.mubr.f32.gmra.mrb[42].mxu1 %v339_v47 }
  0xf5   : > { %2111 = vmatprep.mubr.f32.mxu0 %v276_v48  ;;  %2207 = vmatprep.mubr.f32.mxu1 %v340_v49 }
  0xf8   : > { %2112 = vmatmul.mubr.f32.gmra.mrb[44].mxu0 %v277_v50  ;;  %2208 = vmatmul.mubr.f32.gmra.mrb[44].mxu1 %v341_v51 }
  0xf9   : > { %2114 = vmatprep.mubr.f32.mxu0 %v278_v52  ;;  %2210 = vmatprep.mubr.f32.mxu1 %v342_v53 }
  0xfc   : > { %2115 = vmatmul.mubr.f32.gmra.mrb[46].mxu0 %v279_v54  ;;  %2211 = vmatmul.mubr.f32.gmra.mrb[46].mxu1 %v343_v55 }
  0xfd   : > { %2117 = vmatprep.mubr.f32.mxu0 %v280_v56  ;;  %2213 = vmatprep.mubr.f32.mxu1 %v344_v57 }
 0x100   : > { %2118 = vmatmul.mubr.f32.gmra.mrb[48].mxu0 %v281_v58  ;;  %2214 = vmatmul.mubr.f32.gmra.mrb[48].mxu1 %v345_v59 }
 0x101   : > { %2120 = vmatprep.mubr.f32.mxu0 %v282_v60  ;;  %2216 = vmatprep.mubr.f32.mxu1 %v346_v61 }
 0x104   : > { %2121 = vmatmul.mubr.f32.gmra.mrb[50].mxu0 %v283_v62  ;;  %2217 = vmatmul.mubr.f32.gmra.mrb[50].mxu1 %v347_v63 }
 0x105   : > { %2123 = vmatprep.mubr.f32.mxu0 %v284_v0  ;;  %2219 = vmatprep.mubr.f32.mxu1 %v348_v1 }
 0x108   : > { %2124 = vmatmul.mubr.f32.gmra.mrb[52].mxu0 %v285_v2  ;;  %2220 = vmatmul.mubr.f32.gmra.mrb[52].mxu1 %v349_v3 }
 0x109   : > { %2126 = vmatprep.mubr.f32.mxu0 %v286_v4  ;;  %2222 = vmatprep.mubr.f32.mxu1 %v350_v5 }
 0x10c   : > { %2127 = vmatmul.mubr.f32.gmra.mrb[54].mxu0 %v287_v6  ;;  %2223 = vmatmul.mubr.f32.gmra.mrb[54].mxu1 %v351_v7 }
 0x10d   : > { %2129 = vmatprep.mubr.f32.mxu0 %v288_v8  ;;  %2225 = vmatprep.mubr.f32.mxu1 %v352_v9 }
 0x110   : > { %2130 = vmatmul.mubr.f32.gmra.mrb[56].mxu0 %v289_v10  ;;  %2226 = vmatmul.mubr.f32.gmra.mrb[56].mxu1 %v353_v11 }
 0x111   : > { %2132 = vmatprep.mubr.f32.mxu0 %v290_v12  ;;  %2228 = vmatprep.mubr.f32.mxu1 %v354_v13 }
 0x114   : > { %2133 = vmatmul.mubr.f32.gmra.mrb[58].mxu0 %v291_v14  ;;  %2229 = vmatmul.mubr.f32.gmra.mrb[58].mxu1 %v355_v15 }
 0x115   : > { %2135 = vmatprep.mubr.f32.mxu0 %v292_v16  ;;  %2231 = vmatprep.mubr.f32.mxu1 %v356_v17 }
 0x118   : > { %2136 = vmatmul.mubr.f32.gmra.mrb[60].mxu0 %v293_v18  ;;  %2232 = vmatmul.mubr.f32.gmra.mrb[60].mxu1 %v357_v19 }
 0x119   : > { %2138 = vmatprep.mubr.f32.mxu0 %v294_v20  ;;  %2234 = vmatprep.mubr.f32.mxu1 %v358_v21 }
 0x11c   : > { %2139 = vmatmul.mubr.f32.gmra.mrb[62].mxu0 %v295_v22  ;;  %2235 = vmatmul.mubr.f32.gmra.mrb[62].mxu1 %v359_v23 }
 0x173   : > { %v2047_v25 = vpop.f32.mrb[0].mxu0  ;;  %v2143_v26 = vpop.f32.mrb[0].mxu1 }
 0x174   : > { %v455_v27 = vadd.f32 %v2047_v25, %v3110_v24  ;;  %v775_v28 = vadd.f32 %v2143_v26, %v3110_v24  ;;  %v449_v29 = vpop.f32.mrb[1].mxu0  ;;  %v769_v30 = vpop.f32.mrb[1].mxu1 }
 0x175   : > { %v450_v31 = vadd.f32 %v3110_v24, %v449_v29  ;;  %v770_v32 = vadd.f32 %v3110_v24, %v769_v30 }
 0x176   : > { %v3116_v33 = vmul.f32 0.5, %v455_v27  ;;  %v3118_v34 = vmul.f32 0.5, %v775_v28 }
 0x177   : > { %v3120_v35 = vmul.f32 0.5, %v450_v31  ;;  %v3122_v36 = vmul.f32 0.5, %v770_v32  ;;  %v2050_v37 = vpop.f32.mrb[2].mxu0  ;;  %v2146_v38 = vpop.f32.mrb[2].mxu1 }
 0x178   : > { %2351 = vtanh.f32 %v3116_v33  ;;  %v465_v39 = vadd.f32 %v2050_v37, %v3110_v24  ;;  %v785_v40 = vadd.f32 %v2146_v38, %v3110_v24  ;;  %v459_v41 = vpop.f32.mrb[3].mxu0  ;;  %v779_v42 = vpop.f32.mrb[3].mxu1 }
 0x179   : > { %2353 = vtanh.f32 %v3118_v34  ;;  %v460_v43 = vadd.f32 %v3110_v24, %v459_v41  ;;  %v780_v44 = vadd.f32 %v3110_v24, %v779_v42 }
 0x17a   : > { %2355 = vtanh.f32 %v3120_v35  ;;  %v3131_v45 = vmul.f32 0.5, %v465_v39  ;;  %v3133_v46 = vmul.f32 0.5, %v785_v40 }
 0x17b   : > { %2357 = vtanh.f32 %v3122_v36  ;;  %v3136_v47 = vmul.f32 0.5, %v460_v43  ;;  %v3138_v48 = vmul.f32 0.5, %v780_v44  ;;  %v2053_v49 = vpop.f32.mrb[4].mxu0  ;;  %v2149_v50 = vpop.f32.mrb[4].mxu1 }
 0x17c   : > { %2359 = vtanh.f32 %v3131_v45  ;;  %v475_v51 = vadd.f32 %v2053_v49, %v3110_v24  ;;  %v795_v52 = vadd.f32 %v2149_v50, %v3110_v24  ;;  %v469_v53 = vpop.f32.mrb[5].mxu0  ;;  %v789_v54 = vpop.f32.mrb[5].mxu1 }
 0x17d   : > { %2361 = vtanh.f32 %v3133_v46  ;;  %v470_v55 = vadd.f32 %v3110_v24, %v469_v53  ;;  %v790_v56 = vadd.f32 %v3110_v24, %v789_v54 }
 0x17e   : > { %2363 = vtanh.f32 %v3136_v47  ;;  %v3147_v57 = vmul.f32 0.5, %v475_v51  ;;  %v3149_v58 = vmul.f32 0.5, %v795_v52 }
 0x17f   : > { %2365 = vtanh.f32 %v3138_v48  ;;  %v3152_v59 = vmul.f32 0.5, %v470_v55  ;;  %v3154_v60 = vmul.f32 0.5, %v790_v56  ;;  %v2056_v61 = vpop.f32.mrb[6].mxu0  ;;  %v2152_v62 = vpop.f32.mrb[6].mxu1 }
 0x180   : > { %2367 = vtanh.f32 %v3147_v57  ;;  %v485_v63 = vadd.f32 %v2056_v61, %v3110_v24  ;;  %v805_v0 = vadd.f32 %v2152_v62, %v3110_v24  ;;  %v479_v1 = vpop.f32.mrb[7].mxu0  ;;  %v799_v2 = vpop.f32.mrb[7].mxu1 }
 0x181   : > { %2369 = vtanh.f32 %v3149_v58  ;;  %v480_v3 = vadd.f32 %v3110_v24, %v479_v1  ;;  %v800_v4 = vadd.f32 %v3110_v24, %v799_v2 }
 0x182   : > { %v2352_v5 = vpop.eup %2351  ;;  %2371 = vtanh.f32 %v3152_v59  ;;  %v3163_v6 = vmul.f32 0.5, %v485_v63  ;;  %v3165_v7 = vmul.f32 0.5, %v805_v0 }
 0x183   : > { %v2354_v8 = vpop.eup %2353  ;;  %v1345_v9 = vadd.f32 1.0, %v2352_v5  ;;  %2373 = vtanh.f32 %v3154_v60  ;;  %v3168_v10 = vmul.f32 0.5, %v480_v3  ;;  %v3170_v11 = vmul.f32 0.5, %v800_v4  ;;  %v2059_v12 = vpop.f32.mrb[8].mxu0 }
 0x184   : > { %v2155_v13 = vpop.f32.mrb[8].mxu1  ;;  %v2356_v14 = vpop.eup %2355  ;;  %v1409_v15 = vadd.f32 1.0, %v2354_v8  ;;  %2375 = vtanh.f32 %v3163_v6  ;;  %v495_v16 = vadd.f32 %v2059_v12, %v3110_v24 }
 0x185   : > { %v815_v17 = vadd.f32 %v2155_v13, %v3110_v24  ;;  %v489_v18 = vpop.f32.mrb[9].mxu0  ;;  %v809_v19 = vpop.f32.mrb[9].mxu1  ;;  %v1473_v21 = vmul.f32 %v1345_v9, %v3116_v33  ;;  %v1344_v22 = vadd.f32 1.0, %v2356_v14  ;;  %2377 = vtanh.f32 %v3165_v7 }
 0x186   : > { %v2358_v20 = vpop.eup %2357  ;;  %v490_v23 = vadd.f32 %v3110_v24, %v489_v18  ;;  %v1537_v26 = vmul.f32 %v1409_v15, %v3118_v34  ;;  %2379 = vtanh.f32 %v3168_v10  ;;  %v3180_v28 = vmul.f32 0.5, %v495_v16 }
 0x187   : > { %v2360_v25 = vpop.eup %2359  ;;  %v1408_v27 = vadd.f32 1.0, %v2358_v20  ;;  %1601 = vst [vmem:[%s3184_s23 + $0x8] sm:$0xff] %v1473_v21  ;;  %v1472_v30 = vmul.f32 %v1344_v22, %v3120_v35  ;;  %2381 = vtanh.f32 %v3170_v11  ;;  %v3189_v32 = vmul.f32 0.5, %v815_v17  ;;  %v2062_v33 = vpop.f32.mrb[10].mxu0 }
 0x188   : > { %v2362_v29 = vpop.eup %2361  ;;  %v1347_v31 = vadd.f32 1.0, %v2360_v25  ;;  %v2158_v34 = vpop.f32.mrb[10].mxu1  ;;  %1665 = vst [vmem:[%s3184_s23 + $0x208] sm:$0xff] %v1537_v26  ;;  %2383 = vtanh.f32 %v3180_v28  ;;  %v3194_v40 = vmul.f32 0.5, %v490_v23  ;;  %v810_v49 = vadd.f32 %v3110_v24, %v809_v19 }
 0x189   : > { %v2364_v37 = vpop.eup %2363  ;;  %v1536_v38 = vmul.f32 %v1408_v27, %v3122_v36  ;;  %v1411_v39 = vadd.f32 1.0, %v2362_v29  ;;  %v499_v41 = vpop.f32.mrb[11].mxu0  ;;  %1600 = vst [vmem:[%s3184_s23] sm:$0xff] %v1472_v30  ;;  %2385 = vtanh.f32 %v3189_v32  ;;  %v505_v52 = vadd.f32 %v2062_v33, %v3110_v24 }
 0x18a   : > { %v819_v35 = vpop.f32.mrb[11].mxu1  ;;  %v2366_v42 = vpop.eup %2365  ;;  %v1475_v43 = vmul.f32 %v1347_v31, %v3131_v45  ;;  %v1346_v44 = vadd.f32 1.0, %v2364_v37  ;;  %2387 = vtanh.f32 %v3194_v40  ;;  %v3206_v55 = vmul.f32 0.5, %v810_v49 }
 0x18b   : > { %v2368_v50 = vpop.eup %2367  ;;  %1664 = vst [vmem:[%s3184_s23 + $0x200] sm:$0xff] %v1536_v38  ;;  %v1539_v36 = vmul.f32 %v1411_v39, %v3133_v46  ;;  %v1410_v51 = vadd.f32 1.0, %v2366_v42  ;;  %v825_v56 = vadd.f32 %v2158_v34, %v3110_v24  ;;  %v2065_v61 = vpop.f32.mrb[12].mxu0  ;;  %v3211_v1 = vmul.f32 0.5, %v505_v52 }
 0x18c   : > { %v2370_v53 = vpop.eup %2369  ;;  %1603 = vst [vmem:[%s3184_s23 + $0x18] sm:$0xff] %v1475_v43  ;;  %v1474_v45 = vmul.f32 %v1346_v44, %v3136_v47  ;;  %v1349_v54 = vadd.f32 1.0, %v2368_v50  ;;  %v2161_v62 = vpop.f32.mrb[12].mxu1  ;;  %v500_v2 = vadd.f32 %v3110_v24, %v499_v41  ;;  %2389 = vtanh.f32 %v3206_v55 }
 0x18d   : > { %v2372_v63 = vpop.eup %2371  ;;  %1667 = vst [vmem:[%s3184_s23 + $0x218] sm:$0xff] %v1539_v36  ;;  %v1538_v46 = vmul.f32 %v1410_v51, %v3138_v48  ;;  %v1413_v0 = vadd.f32 1.0, %v2370_v53  ;;  %v509_v3 = vpop.f32.mrb[13].mxu0  ;;  %v3217_v9 = vmul.f32 0.5, %v825_v56  ;;  %2391 = vtanh.f32 %v3211_v1 }
 0x18e   : > { %v829_v47 = vpop.f32.mrb[13].mxu1  ;;  %v2374_v4 = vpop.eup %2373  ;;  %1602 = vst [vmem:[%s3184_s23 + $0x10] sm:$0xff] %v1474_v45  ;;  %v1477_v5 = vmul.f32 %v1349_v54, %v3147_v57  ;;  %v1348_v8 = vadd.f32 1.0, %v2372_v63  ;;  %v3222_v14 = vmul.f32 0.5, %v500_v2  ;;  %v820_v17 = vadd.f32 %v3110_v24, %v819_v35 }
 0x18f   : > { %v2376_v12 = vpop.eup %2375  ;;  %1666 = vst [vmem:[%s3184_s23 + $0x210] sm:$0xff] %v1538_v46  ;;  %v1541_v48 = vmul.f32 %v1413_v0, %v3149_v58  ;;  %v1412_v13 = vadd.f32 1.0, %v2374_v4  ;;  %2393 = vtanh.f32 %v3217_v9  ;;  %v2068_v18 = vpop.f32.mrb[14].mxu0  ;;  %v515_v22 = vadd.f32 %v2065_v61, %v3110_v24 }
 0x190   : > { %v2378_v15 = vpop.eup %2377  ;;  %1605 = vst [vmem:[%s3184_s23 + $0x28] sm:$0xff] %v1477_v5  ;;  %v1476_v57 = vmul.f32 %v1348_v8, %v3152_v59  ;;  %v1351_v16 = vadd.f32 1.0, %v2376_v12  ;;  %v2164_v19 = vpop.f32.mrb[14].mxu1  ;;  %2395 = vtanh.f32 %v3222_v14  ;;  %v3234_v29 = vmul.f32 0.5, %v820_v17 }
 0x191   : > { %v2380_v20 = vpop.eup %2379  ;;  %1669 = vst [vmem:[%s3184_s23 + $0x228] sm:$0xff] %v1541_v48  ;;  %v1540_v58 = vmul.f32 %v1412_v13, %v3154_v60  ;;  %v1415_v21 = vadd.f32 1.0, %v2378_v15  ;;  %v519_v23 = vpop.f32.mrb[15].mxu0  ;;  %v835_v30 = vadd.f32 %v2161_v62, %v3110_v24  ;;  %v3239_v34 = vmul.f32 0.5, %v515_v22 }
 0x192   : > { %v839_v59 = vpop.f32.mrb[15].mxu1  ;;  %v2382_v25 = vpop.eup %2381  ;;  %1604 = vst [vmem:[%s3184_s23 + $0x20] sm:$0xff] %v1476_v57  ;;  %v1479_v26 = vmul.f32 %v1351_v16, %v3163_v6  ;;  %v1350_v27 = vadd.f32 1.0, %v2380_v20  ;;  %v510_v37 = vadd.f32 %v3110_v24, %v509_v3  ;;  %2397 = vtanh.f32 %v3234_v29 }
 0x193   : > { %v2384_v31 = vpop.eup %2383  ;;  %1668 = vst [vmem:[%s3184_s23 + $0x220] sm:$0xff] %v1540_v58  ;;  %v1543_v60 = vmul.f32 %v1415_v21, %v3165_v7  ;;  %v1414_v33 = vadd.f32 1.0, %v2382_v25  ;;  %v3245_v41 = vmul.f32 0.5, %v835_v30  ;;  %v2071_v35 = vpop.f32.mrb[16].mxu0  ;;  %2399 = vtanh.f32 %v3239_v34 }
 0x194   : > { %v2386_v38 = vpop.eup %2385  ;;  %1607 = vst [vmem:[%s3184_s23 + $0x38] sm:$0xff] %v1479_v26  ;;  %v1478_v6 = vmul.f32 %v1350_v27, %v3168_v10  ;;  %v1353_v39 = vadd.f32 1.0, %v2384_v31  ;;  %v2167_v42 = vpop.f32.mrb[16].mxu1  ;;  %v3250_v49 = vmul.f32 0.5, %v510_v37  ;;  %v830_v52 = vadd.f32 %v3110_v24, %v829_v47 }
 0x195   : > { %v2388_v43 = vpop.eup %2387  ;;  %1671 = vst [vmem:[%s3184_s23 + $0x238] sm:$0xff] %v1543_v60  ;;  %v1542_v7 = vmul.f32 %v1414_v33, %v3170_v11  ;;  %v1417_v44 = vadd.f32 1.0, %v2386_v38  ;;  %v529_v50 = vpop.f32.mrb[17].mxu0  ;;  %2401 = vtanh.f32 %v3245_v41  ;;  %v525_v53 = vadd.f32 %v2068_v18, %v3110_v24 }
 0x196   : > { %v849_v10 = vpop.f32.mrb[17].mxu1  ;;  %1606 = vst [vmem:[%s3184_s23 + $0x30] sm:$0xff] %v1478_v6  ;;  %v1481_v36 = vmul.f32 %v1353_v39, %v3180_v28  ;;  %v1352_v51 = vadd.f32 1.0, %v2388_v43  ;;  %2403 = vtanh.f32 %v3250_v49  ;;  %v845_v45 = vadd.f32 %v2164_v19, %v3110_v24  ;;  %v2390_v54 = vpop.eup %2389 }
 0x197   : > { %1670 = vst [vmem:[%s3184_s23 + $0x230] sm:$0xff] %v1542_v7  ;;  %v1545_v11 = vmul.f32 %v1417_v44, %v3189_v32  ;;  %v3263_v56 = vmul.f32 0.5, %v830_v52  ;;  %v520_v61 = vadd.f32 %v3110_v24, %v519_v23  ;;  %v840_v62 = vadd.f32 %v3110_v24, %v839_v59  ;;  %v2074_v63 = vpop.f32.mrb[18].mxu0  ;;  %v2170_v46 = vpop.f32.mrb[18].mxu1 }
 0x198   : > { %1609 = vst [vmem:[%s3184_s23 + $0x48] sm:$0xff] %v1481_v36  ;;  %v1480_v28 = vmul.f32 %v1352_v51, %v3194_v40  ;;  %v2392_v32 = vpop.eup %2391  ;;  %v1416_v0 = vadd.f32 1.0, %v2390_v54  ;;  %v3268_v2 = vmul.f32 0.5, %v525_v53  ;;  %v3270_v3 = vmul.f32 0.5, %v845_v45  ;;  %v539_v4 = vpop.f32.mrb[19].mxu0 }
 0x199   : > { %1673 = vst [vmem:[%s3184_s23 + $0x248] sm:$0xff] %v1545_v11  ;;  %v535_v47 = vadd.f32 %v2071_v35, %v3110_v24  ;;  %v859_v5 = vpop.f32.mrb[19].mxu1  ;;  %v2394_v40 = vpop.eup %2393  ;;  %v1355_v8 = vadd.f32 1.0, %v2392_v32  ;;  %2405 = vtanh.f32 %v3263_v56  ;;  %v3275_v12 = vmul.f32 0.5, %v520_v61 }
 0x19a   : > { %1608 = vst [vmem:[%s3184_s23 + $0x40] sm:$0xff] %v1480_v28  ;;  %v3277_v48 = vmul.f32 0.5, %v840_v62  ;;  %v2396_v13 = vpop.eup %2395  ;;  %v1544_v15 = vmul.f32 %v1416_v0, %v3206_v55  ;;  %v1419_v57 = vadd.f32 1.0, %v2394_v40  ;;  %2407 = vtanh.f32 %v3268_v2 }
 0x19b   : > { %v3281_v16 = vmul.f32 0.5, %v535_v47  ;;  %v1483_v17 = vmul.f32 %v1355_v8, %v3211_v1  ;;  %v1354_v18 = vadd.f32 1.0, %v2396_v13  ;;  %2409 = vtanh.f32 %v3270_v3  ;;  %v2077_v20 = vpop.f32.mrb[20].mxu0  ;;  %v2173_v58 = vpop.f32.mrb[20].mxu1 }
 0x19c   : > { %v855_v19 = vadd.f32 %v2167_v42, %v3110_v24  ;;  %1672 = vst [vmem:[%s3184_s23 + $0x240] sm:$0xff] %v1544_v15  ;;  %v1547_v21 = vmul.f32 %v1419_v57, %v3217_v9  ;;  %2411 = vtanh.f32 %v3275_v12  ;;  %v530_v55 = vadd.f32 %v3110_v24, %v529_v50  ;;  %v549_v23 = vpop.f32.mrb[21].mxu0  ;;  %v869_v1 = vpop.f32.mrb[21].mxu1 }
 0x19d   : > { %v850_v22 = vadd.f32 %v3110_v24, %v849_v10  ;;  %v2398_v59 = vpop.eup %2397  ;;  %1611 = vst [vmem:[%s3184_s23 + $0x58] sm:$0xff] %v1483_v17  ;;  %v1482_v25 = vmul.f32 %v1354_v18, %v3222_v14  ;;  %2413 = vtanh.f32 %v3277_v48  ;;  %v545_v27 = vadd.f32 %v2074_v63, %v3110_v24 }
 0x19e   : > { %v3294_v26 = vmul.f32 0.5, %v855_v19  ;;  %v2400_v9 = vpop.eup %2399  ;;  %1675 = vst [vmem:[%s3184_s23 + $0x258] sm:$0xff] %v1547_v21  ;;  %v1418_v30 = vadd.f32 1.0, %v2398_v59  ;;  %2415 = vtanh.f32 %v3281_v16  ;;  %v3299_v31 = vmul.f32 0.5, %v530_v55 }
 0x19f   : > { %v3301_v60 = vmul.f32 0.5, %v850_v22  ;;  %v2402_v33 = vpop.eup %2401  ;;  %1610 = vst [vmem:[%s3184_s23 + $0x50] sm:$0xff] %v1482_v25  ;;  %v1357_v37 = vadd.f32 1.0, %v2400_v9  ;;  %v3305_v14 = vmul.f32 0.5, %v545_v27  ;;  %v865_v38 = vadd.f32 %v2170_v46, %v3110_v24  ;;  %v2080_v6 = vpop.f32.mrb[22].mxu0 }
 0x1a0   : > { %2417 = vtanh.f32 %v3294_v26  ;;  %v3308_v39 = vpop.f32.mrb[22].mxu1  ;;  %v2404_v35 = vpop.eup %2403  ;;  %v1546_v42 = vmul.f32 %v1418_v30, %v3234_v29  ;;  %v1421_v43 = vadd.f32 1.0, %v2402_v33  ;;  %v540_v7 = vadd.f32 %v3110_v24, %v539_v4 }
 0x1a1   : > { %2419 = vtanh.f32 %v3299_v31  ;;  %v3313_v44 = vpop.f32.mrb[23].mxu0  ;;  %v3315_v50 = vpop.f32.mrb[23].mxu1  ;;  %v1485_v10 = vmul.f32 %v1357_v37, %v3239_v34  ;;  %v1356_v36 = vadd.f32 1.0, %v2404_v35  ;;  %v3319_v51 = vmul.f32 0.5, %v865_v38 }
 0x1a2   : > { %2421 = vtanh.f32 %v3301_v60  ;;  %1674 = vst [vmem:[%s3184_s23 + $0x250] sm:$0xff] %v1546_v42  ;;  %v1549_v29 = vmul.f32 %v1421_v43, %v3245_v41  ;;  %v3324_v52 = vmul.f32 0.5, %v540_v7  ;;  %v860_v11 = vadd.f32 %v3110_v24, %v859_v5 }
 0x1a3   : > { %2423 = vtanh.f32 %v3305_v14  ;;  %v2406_v53 = vpop.eup %2405  ;;  %1613 = vst [vmem:[%s3184_s23 + $0x68] sm:$0xff] %v1485_v10  ;;  %v1484_v34 = vmul.f32 %v1356_v36, %v3250_v49  ;;  %v555_v45 = vadd.f32 %v2077_v20, %v3110_v24  ;;  %v875_v54 = vadd.f32 %v2173_v58, %v3110_v24  ;;  %v3332_v28 = vpop.f32.mrb[24].mxu0 }
 0x1a4   : > { %2425 = vtanh.f32 %v3319_v51  ;;  %v3334_v41 = vpop.f32.mrb[24].mxu1  ;;  %v2408_v61 = vpop.eup %2407  ;;  %1677 = vst [vmem:[%s3184_s23 + $0x268] sm:$0xff] %v1549_v29  ;;  %v1420_v62 = vadd.f32 1.0, %v2406_v53  ;;  %v3338_v63 = vmul.f32 0.5, %v860_v11  ;;  %v550_v46 = vadd.f32 %v3110_v24, %v549_v23 }
 0x1a5   : > { %2427 = vtanh.f32 %v3324_v52  ;;  %v3341_v49 = vpop.f32.mrb[25].mxu0  ;;  %v3343_v32 = vpop.f32.mrb[25].mxu1  ;;  %1612 = vst [vmem:[%s3184_s23 + $0x60] sm:$0xff] %v1484_v34  ;;  %v1359_v47 = vadd.f32 1.0, %v2408_v61  ;;  %v3346_v4 = vmul.f32 0.5, %v555_v45  ;;  %v3348_v5 = vmul.f32 0.5, %v875_v54 }
 0x1a6   : > { %v2410_v0 = vpop.eup %2409  ;;  %v870_v40 = vadd.f32 %v3110_v24, %v869_v1  ;;  %v1548_v13 = vmul.f32 %v1420_v62, %v3263_v56  ;;  %2429 = vtanh.f32 %v3338_v63  ;;  %v3353_v57 = vmul.f32 0.5, %v550_v46 }
 0x1a7   : > { %v2412_v8 = vpop.eup %2411  ;;  %v1423_v15 = vadd.f32 1.0, %v2410_v0  ;;  %v1487_v18 = vmul.f32 %v1359_v47, %v3268_v2  ;;  %2431 = vtanh.f32 %v3346_v4  ;;  %v3359_v58 = vpop.f32.mrb[26].mxu0  ;;  %v565_v23 = vadd.f32 %v2080_v6, %v3110_v24 }
 0x1a8   : > { %v2414_v17 = vpop.eup %2413  ;;  %v1358_v19 = vadd.f32 1.0, %v2412_v8  ;;  %v3357_v20 = vmul.f32 0.5, %v870_v40  ;;  %v3361_v21 = vpop.f32.mrb[26].mxu1  ;;  %1676 = vst [vmem:[%s3184_s23 + $0x260] sm:$0xff] %v1548_v13  ;;  %2433 = vtanh.f32 %v3348_v5  ;;  %v575_v61 = vadd.f32 %v3332_v28, %v3110_v24 }
 0x1a9   : > { %v2416_v56 = vpop.eup %2415  ;;  %v1551_v55 = vmul.f32 %v1423_v15, %v3270_v3  ;;  %v1422_v22 = vadd.f32 1.0, %v2414_v17  ;;  %v3367_v2 = vpop.f32.mrb[27].mxu0  ;;  %1615 = vst [vmem:[%s3184_s23 + $0x78] sm:$0xff] %v1487_v18  ;;  %2435 = vtanh.f32 %v3353_v57  ;;  %v885_v3 = vadd.f32 %v3308_v39, %v3110_v24 }
 0x1aa   : > { %v3369_v1 = vpop.f32.mrb[27].mxu1  ;;  %v2418_v59 = vpop.eup %2417  ;;  %v1486_v25 = vmul.f32 %v1358_v19, %v3275_v12  ;;  %v1361_v27 = vadd.f32 1.0, %v2416_v56  ;;  %2437 = vtanh.f32 %v3357_v20  ;;  %v3379_v37 = vmul.f32 0.5, %v565_v23 }
 0x1ab   : > { %v2420_v9 = vpop.eup %2419  ;;  %1679 = vst [vmem:[%s3184_s23 + $0x278] sm:$0xff] %v1551_v55  ;;  %v1550_v30 = vmul.f32 %v1422_v22, %v3277_v48  ;;  %v1425_v33 = vadd.f32 1.0, %v2418_v59  ;;  %v3383_v35 = vmul.f32 0.5, %v885_v3  ;;  %v560_v39 = vadd.f32 %v3110_v24, %v3313_v44  ;;  %v3387_v42 = vpop.f32.mrb[28].mxu0 }
 0x1ac   : > { %v2422_v38 = vpop.eup %2421  ;;  %1614 = vst [vmem:[%s3184_s23 + $0x70] sm:$0xff] %v1486_v25  ;;  %v1489_v12 = vmul.f32 %v1361_v27, %v3281_v16  ;;  %v1360_v6 = vadd.f32 1.0, %v2420_v9  ;;  %v3389_v43 = vpop.f32.mrb[28].mxu1  ;;  %2439 = vtanh.f32 %v3379_v37  ;;  %v880_v16 = vadd.f32 %v3110_v24, %v3315_v50 }
 0x1ad   : > { %v2424_v48 = vpop.eup %2423  ;;  %1678 = vst [vmem:[%s3184_s23 + $0x270] sm:$0xff] %v1550_v30  ;;  %v1553_v7 = vmul.f32 %v1425_v33, %v3294_v26  ;;  %v1424_v10 = vadd.f32 1.0, %v2422_v38  ;;  %v3396_v36 = vpop.f32.mrb[29].mxu0  ;;  %2441 = vtanh.f32 %v3383_v35  ;;  %v3403_v26 = vmul.f32 0.5, %v560_v39 }
 0x1ae   : > { %v3398_v29 = vpop.f32.mrb[29].mxu1  ;;  %v2426_v44 = vpop.eup %2425  ;;  %1617 = vst [vmem:[%s3184_s23 + $0x88] sm:$0xff] %v1489_v12  ;;  %v1488_v11 = vmul.f32 %v1360_v6, %v3299_v31  ;;  %v1363_v53 = vadd.f32 1.0, %v2424_v48  ;;  %v3407_v50 = vmul.f32 0.5, %v880_v16  ;;  %v895_v46 = vadd.f32 %v3334_v41, %v3110_v24 }
 0x1af   : > { %v2428_v34 = vpop.eup %2427  ;;  %1681 = vst [vmem:[%s3184_s23 + $0x288] sm:$0xff] %v1553_v7  ;;  %v1552_v45 = vmul.f32 %v1424_v10, %v3301_v60  ;;  %v1427_v54 = vadd.f32 1.0, %v2426_v44  ;;  %2443 = vtanh.f32 %v3403_v26  ;;  %v3416_v0 = vpop.f32.mrb[30].mxu0  ;;  %v3423_v28 = vmul.f32 0.5, %v575_v61 }
 0x1b0   : > { %1616 = vst [vmem:[%s3184_s23 + $0x80] sm:$0xff] %v1488_v11  ;;  %v1491_v31 = vmul.f32 %v1363_v53, %v3305_v14  ;;  %v1362_v62 = vadd.f32 1.0, %v2428_v34  ;;  %v3418_v47 = vpop.f32.mrb[30].mxu1  ;;  %v2430_v60 = vpop.eup %2429  ;;  %2445 = vtanh.f32 %v3407_v50  ;;  %v570_v14 = vadd.f32 %v3110_v24, %v3341_v49 }
 0x1b1   : > { %1680 = vst [vmem:[%s3184_s23 + $0x280] sm:$0xff] %v1552_v45  ;;  %v1555_v40 = vmul.f32 %v1427_v54, %v3319_v51  ;;  %v3427_v8 = vpop.f32.mrb[31].mxu0  ;;  %v3429_v41 = vpop.f32.mrb[31].mxu1  ;;  %v1426_v17 = vadd.f32 1.0, %v2430_v60  ;;  %v3433_v18 = vmul.f32 0.5, %v895_v46  ;;  %v890_v51 = vadd.f32 %v3110_v24, %v3343_v32 }
 0x1b2   : > { %v2432_v13 = vpop.eup %2431  ;;  %1619 = vst [vmem:[%s3184_s23 + $0x98] sm:$0xff] %v1491_v31  ;;  %v1490_v15 = vmul.f32 %v1362_v62, %v3324_v52  ;;  %2447 = vtanh.f32 %v3423_v28  ;;  %v3439_v49 = vmul.f32 0.5, %v570_v14  ;;  %v585_v55 = vadd.f32 %v3359_v58, %v3110_v24 }
 0x1b3   : > { %v2434_v19 = vpop.eup %2433  ;;  %1683 = vst [vmem:[%s3184_s23 + $0x298] sm:$0xff] %v1555_v40  ;;  %v1365_v56 = vadd.f32 1.0, %v2432_v13  ;;  %v1554_v52 = vmul.f32 %v1426_v17, %v3338_v63  ;;  %2449 = vtanh.f32 %v3433_v18  ;;  %v3446_v59 = vmul.f32 0.5, %v890_v51  ;;  %v3448_v32 = vpop.f32.mrb[32].mxu0 }
 0x1b4   : > { %v2436_v22 = vpop.eup %2435  ;;  %1618 = vst [vmem:[%s3184_s23 + $0x90] sm:$0xff] %v1490_v15  ;;  %v1429_v23 = vadd.f32 1.0, %v2434_v19  ;;  %v3450_v25 = vpop.f32.mrb[32].mxu1  ;;  %2451 = vtanh.f32 %v3439_v49  ;;  %v3454_v58 = vmul.f32 0.5, %v585_v55  ;;  %v580_v39 = vadd.f32 %v3110_v24, %v3367_v2 }
 0x1b5   : > { %v2438_v27 = vpop.eup %2437  ;;  %v1493_v3 = vmul.f32 %v1365_v56, %v3346_v4  ;;  %v1364_v9 = vadd.f32 1.0, %v2436_v22  ;;  %v3456_v63 = vpop.f32.mrb[33].mxu0  ;;  %1682 = vst [vmem:[%s3184_s23 + $0x290] sm:$0xff] %v1554_v52  ;;  %2453 = vtanh.f32 %v3446_v59  ;;  %v905_v4 = vadd.f32 %v3361_v21, %v3110_v24 }
 0x1b6   : > { %v3458_v30 = vpop.f32.mrb[33].mxu1  ;;  %v1557_v33 = vmul.f32 %v1429_v23, %v3348_v5  ;;  %v1428_v38 = vadd.f32 1.0, %v2438_v27  ;;  %v2440_v12 = vpop.eup %2439  ;;  %2455 = vtanh.f32 %v3454_v58  ;;  %v900_v48 = vadd.f32 %v3110_v24, %v3369_v1 }
 0x1b7   : > { %1621 = vst [vmem:[%s3184_s23 + $0xa8] sm:$0xff] %v1493_v3  ;;  %v1492_v6 = vmul.f32 %v1364_v9, %v3353_v57  ;;  %v2442_v5 = vpop.eup %2441  ;;  %v1367_v10 = vadd.f32 1.0, %v2440_v12  ;;  %v3474_v16 = vmul.f32 0.5, %v905_v4  ;;  %v595_v21 = vadd.f32 %v3387_v42, %v3110_v24  ;;  %v3478_v57 = vpop.f32.mrb[34].mxu0 }
 0x1b8   : > { %1685 = vst [vmem:[%s3184_s23 + $0x2a8] sm:$0xff] %v1557_v33  ;;  %v1556_v7 = vmul.f32 %v1428_v38, %v3357_v20  ;;  %v3480_v44 = vpop.f32.mrb[34].mxu1  ;;  %v1431_v2 = vadd.f32 1.0, %v2442_v5  ;;  %v3483_v11 = vmul.f32 0.5, %v580_v39  ;;  %v3485_v1 = vmul.f32 0.5, %v900_v48  ;;  %v3489_v53 = vpop.f32.mrb[35].mxu0 }
 0x1b9   : > { %1620 = vst [vmem:[%s3184_s23 + $0xa0] sm:$0xff] %v1492_v6  ;;  %v915_v20 = vadd.f32 %v3389_v43, %v3110_v24  ;;  %v3491_v34 = vpop.f32.mrb[35].mxu1  ;;  %v2444_v45 = vpop.eup %2443  ;;  %v1495_v42 = vmul.f32 %v1367_v10, %v3379_v37  ;;  %2457 = vtanh.f32 %v3474_v16  ;;  %v3496_v54 = vmul.f32 0.5, %v595_v21 }
 0x1ba   : > { %1684 = vst [vmem:[%s3184_s23 + $0x2a0] sm:$0xff] %v1556_v7  ;;  %v590_v61 = vadd.f32 %v3110_v24, %v3396_v36  ;;  %v2446_v31 = vpop.eup %2445  ;;  %v1559_v62 = vmul.f32 %v1431_v2, %v3383_v35  ;;  %v1366_v43 = vadd.f32 1.0, %v2444_v45  ;;  %2459 = vtanh.f32 %v3483_v11 }
 0x1bb   : > { %v3502_v46 = vmul.f32 0.5, %v915_v20  ;;  %1623 = vst [vmem:[%s3184_s23 + $0xb8] sm:$0xff] %v1495_v42  ;;  %v1430_v60 = vadd.f32 1.0, %v2446_v31  ;;  %2461 = vtanh.f32 %v3485_v1  ;;  %v910_v40 = vadd.f32 %v3110_v24, %v3398_v29  ;;  %v3510_v14 = vpop.f32.mrb[36].mxu0  ;;  %v3512_v36 = vpop.f32.mrb[36].mxu1 }
 0x1bc   : > { %v3506_v37 = vmul.f32 0.5, %v590_v61  ;;  %v2448_v35 = vpop.eup %2447  ;;  %1687 = vst [vmem:[%s3184_s23 + $0x2b8] sm:$0xff] %v1559_v62  ;;  %v1494_v13 = vmul.f32 %v1366_v43, %v3403_v26  ;;  %2463 = vtanh.f32 %v3496_v54  ;;  %v605_v15 = vadd.f32 %v3416_v0, %v3110_v24  ;;  %v3521_v51 = vpop.f32.mrb[37].mxu0 }
 0x1bd   : > { %v925_v17 = vadd.f32 %v3418_v47, %v3110_v24  ;;  %v3523_v29 = vpop.f32.mrb[37].mxu1  ;;  %v2450_v19 = vpop.eup %2449  ;;  %v1558_v56 = vmul.f32 %v1430_v60, %v3407_v50  ;;  %v1369_v55 = vadd.f32 1.0, %v2448_v35  ;;  %2465 = vtanh.f32 %v3502_v46 }
 0x1be   : > { %v3527_v26 = vmul.f32 0.5, %v910_v40  ;;  %v2452_v22 = vpop.eup %2451  ;;  %1622 = vst [vmem:[%s3184_s23 + $0xb0] sm:$0xff] %v1494_v13  ;;  %v1433_v52 = vadd.f32 1.0, %v2450_v19  ;;  %2467 = vtanh.f32 %v3506_v37  ;;  %v3531_v0 = vmul.f32 0.5, %v605_v15 }
 0x1bf   : > { %v3533_v47 = vmul.f32 0.5, %v925_v17  ;;  %v2454_v23 = vpop.eup %2453  ;;  %1686 = vst [vmem:[%s3184_s23 + $0x2b0] sm:$0xff] %v1558_v56  ;;  %v1497_v27 = vmul.f32 %v1369_v55, %v3423_v28  ;;  %v1368_v50 = vadd.f32 1.0, %v2452_v22  ;;  %v600_v3 = vadd.f32 %v3110_v24, %v3427_v8  ;;  %v3540_v9 = vpop.f32.mrb[38].mxu0 }
 0x1c0   : > { %2469 = vtanh.f32 %v3527_v26  ;;  %v3542_v33 = vpop.f32.mrb[38].mxu1  ;;  %v2456_v38 = vpop.eup %2455  ;;  %v1561_v4 = vmul.f32 %v1433_v52, %v3433_v18  ;;  %v1432_v12 = vadd.f32 1.0, %v2454_v23  ;;  %v920_v28 = vadd.f32 %v3110_v24, %v3429_v41 }
 0x1c1   : > { %2471 = vtanh.f32 %v3531_v0  ;;  %v3548_v6 = vpop.f32.mrb[39].mxu0  ;;  %v3550_v39 = vpop.f32.mrb[39].mxu1  ;;  %1625 = vst [vmem:[%s3184_s23 + $0xc8] sm:$0xff] %v1497_v27  ;;  %v1496_v8 = vmul.f32 %v1368_v50, %v3439_v49  ;;  %v1371_v48 = vadd.f32 1.0, %v2456_v38  ;;  %v3555_v5 = vmul.f32 0.5, %v600_v3 }
 0x1c2   : > { %2473 = vtanh.f32 %v3533_v47  ;;  %1689 = vst [vmem:[%s3184_s23 + $0x2c8] sm:$0xff] %v1561_v4  ;;  %v1560_v18 = vmul.f32 %v1432_v12, %v3446_v59  ;;  %v3559_v7 = vmul.f32 0.5, %v920_v28  ;;  %v615_v41 = vadd.f32 %v3448_v32, %v3110_v24  ;;  %v3617_v38 = vld [vmem:[#allocation7] ss:$0 sm:$0xff] }
 0x1c3   : > { %v935_v10 = vadd.f32 %v3450_v25, %v3110_v24  ;;  %v2458_v21 = vpop.eup %2457  ;;  %1624 = vst [vmem:[%s3184_s23 + $0xc0] sm:$0xff] %v1496_v8  ;;  %v1499_v49 = vmul.f32 %v1371_v48, %v3454_v58  ;;  %2475 = vtanh.f32 %v3555_v5  ;;  %v610_v2 = vadd.f32 %v3110_v24, %v3456_v63  ;;  %v3572_v20 = vpop.f32.mrb[40].mxu0 }
 0x1c4   : > { %v930_v59 = vadd.f32 %v3110_v24, %v3458_v30  ;;  %v3574_v45 = vpop.f32.mrb[40].mxu1  ;;  %v2460_v32 = vpop.eup %2459  ;;  %1688 = vst [vmem:[%s3184_s23 + $0x2c0] sm:$0xff] %v1560_v18  ;;  %v1435_v25 = vadd.f32 1.0, %v2458_v21  ;;  %2477 = vtanh.f32 %v3559_v7  ;;  %v3578_v42 = vmul.f32 0.5, %v615_v41 }
 0x1c5   : > { %v3580_v58 = vmul.f32 0.5, %v935_v10  ;;  %v3582_v61 = vpop.f32.mrb[41].mxu0  ;;  %v3584_v31 = vpop.f32.mrb[41].mxu1  ;;  %1627 = vst [vmem:[%s3184_s23 + $0xd8] sm:$0xff] %v1499_v49  ;;  %v1370_v30 = vadd.f32 1.0, %v2460_v32  ;;  %v3587_v62 = vmul.f32 0.5, %v610_v2  ;;  %v625_v60 = vadd.f32 %v3478_v57, %v3110_v24 }
 0x1c6   : > { %v2462_v63 = vpop.eup %2461  ;;  %v3589_v43 = vmul.f32 0.5, %v930_v59  ;;  %v1563_v35 = vmul.f32 %v1435_v25, %v3474_v16  ;;  %2479 = vtanh.f32 %v3578_v42  ;;  %v945_v15 = vadd.f32 %v3480_v44, %v3110_v24 }
 0x1c7   : > { %v2464_v40 = vpop.eup %2463  ;;  %v1434_v13 = vadd.f32 1.0, %v2462_v63  ;;  %v1498_v19 = vmul.f32 %v1370_v30, %v3483_v11  ;;  %2481 = vtanh.f32 %v3580_v58  ;;  %v3599_v55 = vmul.f32 0.5, %v625_v60  ;;  %v3601_v22 = vpop.f32.mrb[42].mxu0 }
 0x1c8   : > { %v2466_v17 = vpop.eup %2465  ;;  %v1373_v56 = vadd.f32 1.0, %v2464_v40  ;;  %v3603_v57 = vpop.f32.mrb[42].mxu1  ;;  %1691 = vst [vmem:[%s3184_s23 + $0x2d8] sm:$0xff] %v1563_v35  ;;  %2483 = vtanh.f32 %v3587_v62  ;;  %v3608_v24 = vmul.f32 0.5, %v945_v15  ;;  %v940_v8 = vadd.f32 %v3617_v38, %v3491_v34 }
 0x1c9   : > { %v2468_v16 = vpop.eup %2467  ;;  %v1562_v52 = vmul.f32 %v1434_v13, %v3485_v1  ;;  %v1437_v23 = vadd.f32 1.0, %v2466_v17  ;;  %v3610_v44 = vpop.f32.mrb[43].mxu0  ;;  %1626 = vst [vmem:[%s3184_s23 + $0xd0] sm:$0xff] %v1498_v19  ;;  %2485 = vtanh.f32 %v3589_v43  ;;  %v620_v1 = vadd.f32 %v3617_v38, %v3489_v53 }
 0x1ca   : > { %v3612_v11 = vpop.f32.mrb[43].mxu1  ;;  %v2470_v27 = vpop.eup %2469  ;;  %v1501_v50 = vmul.f32 %v1373_v56, %v3496_v54  ;;  %v1372_v3 = vadd.f32 1.0, %v2468_v16  ;;  %2487 = vtanh.f32 %v3599_v55  ;;  %v3637_v34 = vmul.f32 0.5, %v940_v8 }
 0x1cb   : > { %v2472_v4 = vpop.eup %2471  ;;  %1690 = vst [vmem:[%s3184_s23 + $0x2d0] sm:$0xff] %v1562_v52  ;;  %v1565_v12 = vmul.f32 %v1437_v23, %v3502_v46  ;;  %v1436_v28 = vadd.f32 1.0, %v2470_v27  ;;  %2489 = vtanh.f32 %v3608_v24  ;;  %v3629_v41 = vmul.f32 0.5, %v620_v1  ;;  %v3631_v53 = vpop.f32.mrb[44].mxu0 }
 0x1cc   : > { %v2474_v54 = vpop.eup %2473  ;;  %1629 = vst [vmem:[%s3184_s23 + $0xe8] sm:$0xff] %v1501_v50  ;;  %v1500_v48 = vmul.f32 %v1372_v3, %v3506_v37  ;;  %v1375_v18 = vadd.f32 1.0, %v2472_v4  ;;  %v3633_v46 = vpop.f32.mrb[44].mxu1  ;;  %v635_v37 = vadd.f32 %v3617_v38, %v3510_v14  ;;  %v630_v25 = vadd.f32 %v3617_v38, %v3521_v51 }
 0x1cd   : > { %1693 = vst [vmem:[%s3184_s23 + $0x2e8] sm:$0xff] %v1565_v12  ;;  %v1564_v10 = vmul.f32 %v1436_v28, %v3527_v26  ;;  %v1439_v21 = vadd.f32 1.0, %v2474_v54  ;;  %v3641_v49 = vpop.f32.mrb[45].mxu0  ;;  %v3643_v2 = vpop.f32.mrb[45].mxu1  ;;  %2491 = vtanh.f32 %v3629_v41  ;;  %v955_v26 = vadd.f32 %v3617_v38, %v3512_v36 }
 0x1ce   : > { %v2476_v59 = vpop.eup %2475  ;;  %1628 = vst [vmem:[%s3184_s23 + $0xe0] sm:$0xff] %v1500_v48  ;;  %v1503_v32 = vmul.f32 %v1375_v18, %v3531_v0  ;;  %2493 = vtanh.f32 %v3637_v34  ;;  %v3655_v60 = vmul.f32 0.5, %v635_v37  ;;  %v3660_v35 = vmul.f32 0.5, %v630_v25 }
 0x1cf   : > { %v2478_v63 = vpop.eup %2477  ;;  %1692 = vst [vmem:[%s3184_s23 + $0x2e0] sm:$0xff] %v1564_v10  ;;  %v1567_v14 = vmul.f32 %v1439_v21, %v3533_v47  ;;  %v1374_v30 = vadd.f32 1.0, %v2476_v59  ;;  %v3658_v40 = vmul.f32 0.5, %v955_v26  ;;  %v950_v36 = vadd.f32 %v3617_v38, %v3523_v29  ;;  %v3664_v13 = vpop.f32.mrb[46].mxu0 }
 0x1d0   : > { %1631 = vst [vmem:[%s3184_s23 + $0xf8] sm:$0xff] %v1503_v32  ;;  %v1438_v0 = vadd.f32 1.0, %v2478_v63  ;;  %v3666_v51 = vpop.f32.mrb[46].mxu1  ;;  %v2480_v47 = vpop.eup %2479  ;;  %2495 = vtanh.f32 %v3655_v60  ;;  %v645_v17 = vadd.f32 %v3617_v38, %v3540_v9  ;;  %v965_v19 = vadd.f32 %v3617_v38, %v3542_v33 }
 0x1d1   : > { %1695 = vst [vmem:[%s3184_s23 + $0x2f8] sm:$0xff] %v1567_v14  ;;  %v1502_v15 = vmul.f32 %v1374_v30, %v3555_v5  ;;  %v3675_v56 = vpop.f32.mrb[47].mxu0  ;;  %v3677_v29 = vpop.f32.mrb[47].mxu1  ;;  %v1377_v23 = vadd.f32 1.0, %v2480_v47  ;;  %2497 = vtanh.f32 %v3658_v40  ;;  %v3681_v5 = vmul.f32 0.5, %v950_v36 }
 0x1d2   : > { %v2482_v16 = vpop.eup %2481  ;;  %v1566_v52 = vmul.f32 %v1438_v0, %v3559_v7  ;;  %2499 = vtanh.f32 %v3660_v35  ;;  %v3685_v9 = vmul.f32 0.5, %v645_v17  ;;  %v3687_v33 = vmul.f32 0.5, %v965_v19 }
 0x1d3   : > { %v2484_v27 = vpop.eup %2483  ;;  %1630 = vst [vmem:[%s3184_s23 + $0xf0] sm:$0xff] %v1502_v15  ;;  %v1441_v50 = vadd.f32 1.0, %v2482_v16  ;;  %v1505_v1 = vmul.f32 %v1377_v23, %v3578_v42  ;;  %2501 = vtanh.f32 %v3681_v5  ;;  %v640_v4 = vadd.f32 %v3617_v38, %v3548_v6  ;;  %v3694_v12 = vpop.f32.mrb[48].mxu0 }
 0x1d4   : > { %v2486_v3 = vpop.eup %2485  ;;  %1694 = vst [vmem:[%s3184_s23 + $0x2f0] sm:$0xff] %v1566_v52  ;;  %v1376_v7 = vadd.f32 1.0, %v2484_v27  ;;  %v3696_v28 = vpop.f32.mrb[48].mxu1  ;;  %2503 = vtanh.f32 %v3685_v9  ;;  %v960_v42 = vadd.f32 %v3617_v38, %v3550_v39  ;;  %v655_v39 = vadd.f32 %v3617_v38, %v3572_v20 }
 0x1d5   : > { %v2488_v8 = vpop.eup %2487  ;;  %v1569_v54 = vmul.f32 %v1441_v50, %v3580_v58  ;;  %v1440_v48 = vadd.f32 1.0, %v2486_v3  ;;  %v3702_v18 = vpop.f32.mrb[49].mxu0  ;;  %1633 = vst [vmem:[%s3184_s23 + $0x108] sm:$0xff] %v1505_v1  ;;  %2505 = vtanh.f32 %v3687_v33  ;;  %v3709_v58 = vmul.f32 0.5, %v640_v4 }
 0x1d6   : > { %v3704_v10 = vpop.f32.mrb[49].mxu1  ;;  %v2490_v6 = vpop.eup %2489  ;;  %v1504_v21 = vmul.f32 %v1376_v7, %v3587_v62  ;;  %v1379_v37 = vadd.f32 1.0, %v2488_v8  ;;  %v3713_v26 = vmul.f32 0.5, %v960_v42  ;;  %v975_v63 = vadd.f32 %v3617_v38, %v3574_v45 }
 0x1d7   : > { %1697 = vst [vmem:[%s3184_s23 + $0x308] sm:$0xff] %v1569_v54  ;;  %v1568_v59 = vmul.f32 %v1440_v48, %v3589_v43  ;;  %v1443_v32 = vadd.f32 1.0, %v2490_v6  ;;  %v2492_v25 = vpop.eup %2491  ;;  %2507 = vtanh.f32 %v3709_v58  ;;  %v650_v14 = vadd.f32 %v3617_v38, %v3582_v61  ;;  %v3724_v43 = vpop.f32.mrb[50].mxu0 }
 0x1d8   : > { %1632 = vst [vmem:[%s3184_s23 + $0x100] sm:$0xff] %v1504_v21  ;;  %v1507_v62 = vmul.f32 %v1379_v37, %v3599_v55  ;;  %v3726_v30 = vpop.f32.mrb[50].mxu1  ;;  %v2494_v0 = vpop.eup %2493  ;;  %v1378_v36 = vadd.f32 1.0, %v2492_v25  ;;  %2509 = vtanh.f32 %v3713_v26  ;;  %v3731_v55 = vmul.f32 0.5, %v655_v39 }
 0x1d9   : > { %1696 = vst [vmem:[%s3184_s23 + $0x300] sm:$0xff] %v1568_v59  ;;  %v1571_v20 = vmul.f32 %v1443_v32, %v3608_v24  ;;  %v3733_v47 = vpop.f32.mrb[51].mxu0  ;;  %v3735_v45 = vpop.f32.mrb[51].mxu1  ;;  %v1442_v61 = vadd.f32 1.0, %v2494_v0  ;;  %v3738_v15 = vmul.f32 0.5, %v975_v63  ;;  %v3740_v17 = vmul.f32 0.5, %v650_v14 }
 0x1da   : > { %1635 = vst [vmem:[%s3184_s23 + $0x118] sm:$0xff] %v1507_v62  ;;  %v970_v19 = vadd.f32 %v3617_v38, %v3584_v31  ;;  %v2496_v24 = vpop.eup %2495  ;;  %v1506_v16 = vmul.f32 %v1378_v36, %v3629_v41  ;;  %2511 = vtanh.f32 %v3731_v55  ;;  %v665_v52 = vadd.f32 %v3617_v38, %v3601_v22 }
 0x1db   : > { %1699 = vst [vmem:[%s3184_s23 + $0x318] sm:$0xff] %v1571_v20  ;;  %v985_v23 = vadd.f32 %v3617_v38, %v3603_v57  ;;  %v2498_v27 = vpop.eup %2497  ;;  %v1570_v50 = vmul.f32 %v1442_v61, %v3637_v34  ;;  %v1381_v3 = vadd.f32 1.0, %v2496_v24  ;;  %2513 = vtanh.f32 %v3738_v15  ;;  %v3755_v1 = vpop.f32.mrb[52].mxu0 }
 0x1dc   : > { %v3753_v31 = vmul.f32 0.5, %v970_v19  ;;  %v3757_v41 = vpop.f32.mrb[52].mxu1  ;;  %v2500_v7 = vpop.eup %2499  ;;  %1634 = vst [vmem:[%s3184_s23 + $0x110] sm:$0xff] %v1506_v16  ;;  %v1445_v4 = vadd.f32 1.0, %v2498_v27  ;;  %2515 = vtanh.f32 %v3740_v17  ;;  %v3761_v22 = vmul.f32 0.5, %v665_v52 }
 0x1dd   : > { %v3763_v57 = vmul.f32 0.5, %v985_v23  ;;  %v3765_v34 = vpop.f32.mrb[53].mxu0  ;;  %v3767_v8 = vpop.f32.mrb[53].mxu1  ;;  %1698 = vst [vmem:[%s3184_s23 + $0x310] sm:$0xff] %v1570_v50  ;;  %v1509_v48 = vmul.f32 %v1381_v3, %v3655_v60  ;;  %v1380_v42 = vadd.f32 1.0, %v2500_v7  ;;  %v660_v6 = vadd.f32 %v3617_v38, %v3610_v44 }
 0x1de   : > { %v2502_v54 = vpop.eup %2501  ;;  %2517 = vtanh.f32 %v3753_v31  ;;  %v1573_v37 = vmul.f32 %v1445_v4, %v3658_v40  ;;  %v980_v32 = vadd.f32 %v3617_v38, %v3612_v11  ;;  %v670_v19 = vadd.f32 %v3617_v38, %v3641_v49 }
 0x1df   : > { %v2504_v21 = vpop.eup %2503  ;;  %v1444_v59 = vadd.f32 1.0, %v2502_v54  ;;  %2519 = vtanh.f32 %v3761_v22  ;;  %1637 = vst [vmem:[%s3184_s23 + $0x128] sm:$0xff] %v1509_v48  ;;  %v1508_v60 = vmul.f32 %v1380_v42, %v3660_v35  ;;  %v3781_v62 = vmul.f32 0.5, %v660_v6  ;;  %v3783_v44 = vpop.f32.mrb[54].mxu0 }
 0x1e0   : > { %v2506_v39 = vpop.eup %2505  ;;  %v1383_v25 = vadd.f32 1.0, %v2504_v21  ;;  %2521 = vtanh.f32 %v3763_v57  ;;  %v3785_v40 = vpop.f32.mrb[54].mxu1  ;;  %1701 = vst [vmem:[%s3184_s23 + $0x328] sm:$0xff] %v1573_v37  ;;  %v3789_v11 = vmul.f32 0.5, %v980_v32  ;;  %v675_v35 = vadd.f32 %v3617_v38, %v3631_v53 }
 0x1e1   : > { %v1572_v63 = vmul.f32 %v1444_v59, %v3681_v5  ;;  %v1447_v14 = vadd.f32 1.0, %v2506_v39  ;;  %v3793_v0 = vpop.f32.mrb[55].mxu0  ;;  %v3795_v20 = vpop.f32.mrb[55].mxu1  ;;  %1636 = vst [vmem:[%s3184_s23 + $0x120] sm:$0xff] %v1508_v60  ;;  %2523 = vtanh.f32 %v3781_v62  ;;  %v995_v5 = vadd.f32 %v3617_v38, %v3633_v46 }
 0x1e2   : > { %v2508_v36 = vpop.eup %2507  ;;  %v1511_v61 = vmul.f32 %v1383_v25, %v3685_v9  ;;  %2525 = vtanh.f32 %v3789_v11  ;;  %v3807_v52 = vmul.f32 0.5, %v675_v35  ;;  %v3812_v27 = vmul.f32 0.5, %v670_v19 }
 0x1e3   : > { %v2510_v24 = vpop.eup %2509  ;;  %1700 = vst [vmem:[%s3184_s23 + $0x320] sm:$0xff] %v1572_v63  ;;  %v1575_v53 = vmul.f32 %v1447_v14, %v3687_v33  ;;  %v1382_v16 = vadd.f32 1.0, %v2508_v36  ;;  %v3810_v23 = vmul.f32 0.5, %v995_v5  ;;  %v990_v46 = vadd.f32 %v3617_v38, %v3643_v2  ;;  %v3816_v50 = vpop.f32.mrb[56].mxu0 }
 0x1e4   : > { %1639 = vst [vmem:[%s3184_s23 + $0x138] sm:$0xff] %v1511_v61  ;;  %v1446_v9 = vadd.f32 1.0, %v2510_v24  ;;  %v3818_v49 = vpop.f32.mrb[56].mxu1  ;;  %v2512_v33 = vpop.eup %2511  ;;  %2527 = vtanh.f32 %v3807_v52  ;;  %v685_v7 = vadd.f32 %v3617_v38, %v3664_v13  ;;  %v1005_v4 = vadd.f32 %v3617_v38, %v3666_v51 }
 0x1e5   : > { %1703 = vst [vmem:[%s3184_s23 + $0x338] sm:$0xff] %v1575_v53  ;;  %v1510_v3 = vmul.f32 %v1382_v16, %v3709_v58  ;;  %v3827_v54 = vpop.f32.mrb[57].mxu0  ;;  %v3829_v2 = vpop.f32.mrb[57].mxu1  ;;  %v1385_v6 = vadd.f32 1.0, %v2512_v33  ;;  %2529 = vtanh.f32 %v3810_v23  ;;  %v3833_v58 = vmul.f32 0.5, %v990_v46 }
 0x1e6   : > { %v2514_v48 = vpop.eup %2513  ;;  %v1574_v42 = vmul.f32 %v1446_v9, %v3713_v26  ;;  %2531 = vtanh.f32 %v3812_v27  ;;  %v3837_v13 = vmul.f32 0.5, %v685_v7  ;;  %v3839_v51 = vmul.f32 0.5, %v1005_v4 }
 0x1e7   : > { %v2516_v21 = vpop.eup %2515  ;;  %1638 = vst [vmem:[%s3184_s23 + $0x130] sm:$0xff] %v1510_v3  ;;  %v1449_v37 = vadd.f32 1.0, %v2514_v48  ;;  %v1513_v32 = vmul.f32 %v1385_v6, %v3731_v55  ;;  %2533 = vtanh.f32 %v3833_v58  ;;  %v680_v39 = vadd.f32 %v3617_v38, %v3675_v56  ;;  %v3846_v60 = vpop.f32.mrb[58].mxu0 }
 0x1e8   : > { %v2518_v59 = vpop.eup %2517  ;;  %1702 = vst [vmem:[%s3184_s23 + $0x330] sm:$0xff] %v1574_v42  ;;  %v1384_v26 = vadd.f32 1.0, %v2516_v21  ;;  %v3848_v25 = vpop.f32.mrb[58].mxu1  ;;  %2535 = vtanh.f32 %v3837_v13  ;;  %v1000_v55 = vadd.f32 %v3617_v38, %v3677_v29  ;;  %v695_v29 = vadd.f32 %v3617_v38, %v3694_v12 }
 0x1e9   : > { %v2520_v63 = vpop.eup %2519  ;;  %v1577_v14 = vmul.f32 %v1449_v37, %v3738_v15  ;;  %v1448_v35 = vadd.f32 1.0, %v2518_v59  ;;  %v3854_v36 = vpop.f32.mrb[59].mxu0  ;;  %1641 = vst [vmem:[%s3184_s23 + $0x148] sm:$0xff] %v1513_v32  ;;  %2537 = vtanh.f32 %v3839_v51  ;;  %v3861_v15 = vmul.f32 0.5, %v680_v39 }
 0x1ea   : > { %v3856_v61 = vpop.f32.mrb[59].mxu1  ;;  %v2522_v56 = vpop.eup %2521  ;;  %v1512_v5 = vmul.f32 %v1384_v26, %v3740_v17  ;;  %v1387_v19 = vadd.f32 1.0, %v2520_v63  ;;  %v3865_v16 = vmul.f32 0.5, %v1000_v55  ;;  %v1015_v46 = vadd.f32 %v3617_v38, %v3696_v28 }
 0x1eb   : > { %1705 = vst [vmem:[%s3184_s23 + $0x348] sm:$0xff] %v1577_v14  ;;  %v1576_v24 = vmul.f32 %v1448_v35, %v3753_v31  ;;  %v1451_v53 = vadd.f32 1.0, %v2522_v56  ;;  %v2524_v9 = vpop.eup %2523  ;;  %2539 = vtanh.f32 %v3861_v15  ;;  %v690_v33 = vadd.f32 %v3617_v38, %v3702_v18  ;;  %v3876_v31 = vpop.f32.mrb[60].mxu0 }
 0x1ec   : > { %1640 = vst [vmem:[%s3184_s23 + $0x140] sm:$0xff] %v1512_v5  ;;  %v1515_v17 = vmul.f32 %v1387_v19, %v3761_v22  ;;  %v3878_v3 = vpop.f32.mrb[60].mxu1  ;;  %v2526_v7 = vpop.eup %2525  ;;  %v1386_v4 = vadd.f32 1.0, %v2524_v9  ;;  %2541 = vtanh.f32 %v3865_v16  ;;  %v3883_v22 = vmul.f32 0.5, %v695_v29 }
 0x1ed   : > { %1704 = vst [vmem:[%s3184_s23 + $0x340] sm:$0xff] %v1576_v24  ;;  %v1579_v12 = vmul.f32 %v1451_v53, %v3763_v57  ;;  %v3885_v48 = vpop.f32.mrb[61].mxu0  ;;  %v3887_v28 = vpop.f32.mrb[61].mxu1  ;;  %v1450_v18 = vadd.f32 1.0, %v2526_v7  ;;  %v3890_v42 = vmul.f32 0.5, %v1015_v46  ;;  %v3892_v6 = vmul.f32 0.5, %v690_v33 }
 0x1ee   : > { %1643 = vst [vmem:[%s3184_s23 + $0x158] sm:$0xff] %v1515_v17  ;;  %v1010_v21 = vadd.f32 %v3617_v38, %v3704_v10  ;;  %v2528_v57 = vpop.eup %2527  ;;  %v1514_v37 = vmul.f32 %v1386_v4, %v3781_v62  ;;  %2543 = vtanh.f32 %v3883_v22  ;;  %v705_v59 = vadd.f32 %v3617_v38, %v3724_v43 }
 0x1ef   : > { %1707 = vst [vmem:[%s3184_s23 + $0x358] sm:$0xff] %v1579_v12  ;;  %v1025_v32 = vadd.f32 %v3617_v38, %v3726_v30  ;;  %v2530_v26 = vpop.eup %2529  ;;  %v1578_v39 = vmul.f32 %v1450_v18, %v3789_v11  ;;  %v1389_v63 = vadd.f32 1.0, %v2528_v57  ;;  %2545 = vtanh.f32 %v3890_v42  ;;  %v3907_v14 = vpop.f32.mrb[62].mxu0 }
 0x1f0   : > { %v3905_v10 = vmul.f32 0.5, %v1010_v21  ;;  %v3909_v62 = vpop.f32.mrb[62].mxu1  ;;  %v2532_v35 = vpop.eup %2531  ;;  %1642 = vst [vmem:[%s3184_s23 + $0x150] sm:$0xff] %v1514_v37  ;;  %v1453_v55 = vadd.f32 1.0, %v2530_v26  ;;  %2547 = vtanh.f32 %v3892_v6  ;;  %v3913_v43 = vmul.f32 0.5, %v705_v59 }
 0x1f1   : > { %v3915_v30 = vmul.f32 0.5, %v1025_v32  ;;  %v3917_v11 = vpop.f32.mrb[63].mxu0  ;;  %v3919_v56 = vpop.f32.mrb[63].mxu1  ;;  %1706 = vst [vmem:[%s3184_s23 + $0x350] sm:$0xff] %v1578_v39  ;;  %v1517_v19 = vmul.f32 %v1389_v63, %v3807_v52  ;;  %v1388_v24 = vadd.f32 1.0, %v2532_v35  ;;  %v700_v53 = vadd.f32 %v3617_v38, %v3733_v47 }
 0x1f2   : > { %v2534_v5 = vpop.eup %2533  ;;  %2549 = vtanh.f32 %v3905_v10  ;;  %v1581_v9 = vmul.f32 %v1453_v55, %v3810_v23  ;;  %v1020_v46 = vadd.f32 %v3617_v38, %v3735_v45  ;;  %v715_v45 = vadd.f32 %v3617_v38, %v3755_v1 }
 0x1f3   : > { %v2536_v29 = vpop.eup %2535  ;;  %v1452_v17 = vadd.f32 1.0, %v2534_v5  ;;  %2551 = vtanh.f32 %v3913_v43  ;;  %1645 = vst [vmem:[%s3184_s23 + $0x168] sm:$0xff] %v1517_v19  ;;  %v1516_v52 = vmul.f32 %v1388_v24, %v3812_v27  ;;  %v3933_v12 = vmul.f32 0.5, %v700_v53 }
 0x1f4   : > { %v2538_v33 = vpop.eup %2537  ;;  %v1391_v7 = vadd.f32 1.0, %v2536_v29  ;;  %2553 = vtanh.f32 %v3915_v30  ;;  %1709 = vst [vmem:[%s3184_s23 + $0x368] sm:$0xff] %v1581_v9  ;;  %v3937_v4 = vmul.f32 0.5, %v1020_v46  ;;  %v1035_v21 = vadd.f32 %v3617_v38, %v3757_v41 }
 0x1f5   : > { %v1580_v47 = vmul.f32 %v1452_v17, %v3833_v58  ;;  %v1455_v23 = vadd.f32 1.0, %v2538_v33  ;;  %v2540_v18 = vpop.eup %2539  ;;  %1644 = vst [vmem:[%s3184_s23 + $0x160] sm:$0xff] %v1516_v52  ;;  %2555 = vtanh.f32 %v3933_v12  ;;  %v710_v58 = vadd.f32 %v3617_v38, %v3765_v34 }
 0x1f6   : > { %v1519_v27 = vmul.f32 %v1391_v7, %v3837_v13  ;;  %v2542_v57 = vpop.eup %2541  ;;  %v1390_v59 = vadd.f32 1.0, %v2540_v18  ;;  %2557 = vtanh.f32 %v3937_v4  ;;  %v3951_v1 = vmul.f32 0.5, %v715_v45 }
 0x1f7   : > { %1708 = vst [vmem:[%s3184_s23 + $0x360] sm:$0xff] %v1580_v47  ;;  %v1583_v37 = vmul.f32 %v1455_v23, %v3839_v51  ;;  %v1454_v13 = vadd.f32 1.0, %v2542_v57  ;;  %v3954_v32 = vmul.f32 0.5, %v1035_v21  ;;  %v3956_v26 = vmul.f32 0.5, %v710_v58 }
 0x1f8   : > { %1647 = vst [vmem:[%s3184_s23 + $0x178] sm:$0xff] %v1519_v27  ;;  %v1030_v41 = vadd.f32 %v3617_v38, %v3767_v8  ;;  %v2544_v34 = vpop.eup %2543  ;;  %v1518_v39 = vmul.f32 %v1390_v59, %v3861_v15  ;;  %2559 = vtanh.f32 %v3951_v1  ;;  %v725_v51 = vadd.f32 %v3617_v38, %v3783_v44 }
 0x1f9   : > { %1711 = vst [vmem:[%s3184_s23 + $0x378] sm:$0xff] %v1583_v37  ;;  %v1045_v63 = vadd.f32 %v3617_v38, %v3785_v40  ;;  %v2546_v35 = vpop.eup %2545  ;;  %v1582_v55 = vmul.f32 %v1454_v13, %v3865_v16  ;;  %v1393_v5 = vadd.f32 1.0, %v2544_v34  ;;  %2561 = vtanh.f32 %v3954_v32 }
 0x1fa   : > { %v3969_v8 = vmul.f32 0.5, %v1030_v41  ;;  %v2548_v19 = vpop.eup %2547  ;;  %1646 = vst [vmem:[%s3184_s23 + $0x170] sm:$0xff] %v1518_v39  ;;  %v1457_v15 = vadd.f32 1.0, %v2546_v35  ;;  %2563 = vtanh.f32 %v3956_v26  ;;  %v3973_v24 = vmul.f32 0.5, %v725_v51 }
 0x1fb   : > { %v3975_v44 = vmul.f32 0.5, %v1045_v63  ;;  %1710 = vst [vmem:[%s3184_s23 + $0x370] sm:$0xff] %v1582_v55  ;;  %v1521_v40 = vmul.f32 %v1393_v5, %v3883_v22  ;;  %v1392_v16 = vadd.f32 1.0, %v2548_v19  ;;  %v720_v29 = vadd.f32 %v3617_v38, %v3793_v0 }
 0x1fc   : > { %v2550_v53 = vpop.eup %2549  ;;  %2565 = vtanh.f32 %v3969_v8  ;;  %v1585_v17 = vmul.f32 %v1457_v15, %v3890_v42  ;;  %v1040_v33 = vadd.f32 %v3617_v38, %v3795_v20  ;;  %v735_v20 = vadd.f32 %v3617_v38, %v3816_v50 }
 0x1fd   : > { %v2552_v9 = vpop.eup %2551  ;;  %v1456_v46 = vadd.f32 1.0, %v2550_v53  ;;  %2567 = vtanh.f32 %v3973_v24  ;;  %1649 = vst [vmem:[%s3184_s23 + $0x188] sm:$0xff] %v1521_v40  ;;  %v1520_v22 = vmul.f32 %v1392_v16, %v3892_v6  ;;  %v3989_v47 = vmul.f32 0.5, %v720_v29 }
 0x1fe   : > { %v2554_v52 = vpop.eup %2553  ;;  %v1395_v7 = vadd.f32 1.0, %v2552_v9  ;;  %2569 = vtanh.f32 %v3975_v44  ;;  %1713 = vst [vmem:[%s3184_s23 + $0x388] sm:$0xff] %v1585_v17  ;;  %v3993_v23 = vmul.f32 0.5, %v1040_v33  ;;  %v1055_v18 = vadd.f32 %v3617_v38, %v3818_v49 }
 0x1ff   : > { %v1584_v0 = vmul.f32 %v1456_v46, %v3905_v10  ;;  %v1459_v42 = vadd.f32 1.0, %v2554_v52  ;;  %v2556_v45 = vpop.eup %2555  ;;  %1648 = vst [vmem:[%s3184_s23 + $0x180] sm:$0xff] %v1520_v22  ;;  %2571 = vtanh.f32 %v3989_v47  ;;  %v730_v10 = vadd.f32 %v3617_v38, %v3827_v54 }
 0x200   : > { %v1523_v6 = vmul.f32 %v1395_v7, %v3913_v43  ;;  %v2558_v27 = vpop.eup %2557  ;;  %v1394_v58 = vadd.f32 1.0, %v2556_v45  ;;  %2573 = vtanh.f32 %v3993_v23  ;;  %v4007_v50 = vmul.f32 0.5, %v735_v20 }
 0x201   : > { %1712 = vst [vmem:[%s3184_s23 + $0x380] sm:$0xff] %v1584_v0  ;;  %v1587_v21 = vmul.f32 %v1459_v42, %v3915_v30  ;;  %v1458_v43 = vadd.f32 1.0, %v2558_v27  ;;  %v4010_v57 = vmul.f32 0.5, %v1055_v18  ;;  %v4012_v37 = vmul.f32 0.5, %v730_v10 }
 0x202   : > { %1651 = vst [vmem:[%s3184_s23 + $0x198] sm:$0xff] %v1523_v6  ;;  %v1050_v49 = vadd.f32 %v3617_v38, %v3829_v2  ;;  %v2560_v54 = vpop.eup %2559  ;;  %v1522_v59 = vmul.f32 %v1394_v58, %v3933_v12  ;;  %2575 = vtanh.f32 %v4007_v50  ;;  %v745_v30 = vadd.f32 %v3617_v38, %v3846_v60 }
 0x203   : > { %1715 = vst [vmem:[%s3184_s23 + $0x398] sm:$0xff] %v1587_v21  ;;  %v1065_v13 = vadd.f32 %v3617_v38, %v3848_v25  ;;  %v2562_v41 = vpop.eup %2561  ;;  %v1586_v34 = vmul.f32 %v1458_v43, %v3937_v4  ;;  %v1397_v39 = vadd.f32 1.0, %v2560_v54  ;;  %2577 = vtanh.f32 %v4010_v57 }
 0x204   : > { %v4025_v2 = vmul.f32 0.5, %v1050_v49  ;;  %v2564_v51 = vpop.eup %2563  ;;  %1650 = vst [vmem:[%s3184_s23 + $0x190] sm:$0xff] %v1522_v59  ;;  %v1461_v12 = vadd.f32 1.0, %v2562_v41  ;;  %2579 = vtanh.f32 %v4012_v37  ;;  %v4029_v63 = vmul.f32 0.5, %v745_v30 }
 0x205   : > { %v4031_v60 = vmul.f32 0.5, %v1065_v13  ;;  %1714 = vst [vmem:[%s3184_s23 + $0x390] sm:$0xff] %v1586_v34  ;;  %v1525_v25 = vmul.f32 %v1397_v39, %v3951_v1  ;;  %v1396_v4 = vadd.f32 1.0, %v2564_v51  ;;  %v740_v55 = vadd.f32 %v3617_v38, %v3854_v36 }
 0x206   : > { %v2566_v35 = vpop.eup %2565  ;;  %2581 = vtanh.f32 %v4025_v2  ;;  %v1589_v19 = vmul.f32 %v1461_v12, %v3954_v32  ;;  %v1060_v53 = vadd.f32 %v3617_v38, %v3856_v61  ;;  %v755_v61 = vadd.f32 %v3617_v38, %v3876_v31 }
 0x207   : > { %v2568_v5 = vpop.eup %2567  ;;  %v1460_v15 = vadd.f32 1.0, %v2566_v35  ;;  %2583 = vtanh.f32 %v4029_v63  ;;  %1653 = vst [vmem:[%s3184_s23 + $0x1a8] sm:$0xff] %v1525_v25  ;;  %v1524_v1 = vmul.f32 %v1396_v4, %v3956_v26  ;;  %v4045_v29 = vmul.f32 0.5, %v740_v55 }
 0x208   : > { %v2570_v40 = vpop.eup %2569  ;;  %v1399_v16 = vadd.f32 1.0, %v2568_v5  ;;  %2585 = vtanh.f32 %v4031_v60  ;;  %1717 = vst [vmem:[%s3184_s23 + $0x3a8] sm:$0xff] %v1589_v19  ;;  %v4049_v9 = vmul.f32 0.5, %v1060_v53  ;;  %v1075_v46 = vadd.f32 %v3617_v38, %v3878_v3 }
 0x209   : > { %v1588_v36 = vmul.f32 %v1460_v15, %v3969_v8  ;;  %v1463_v32 = vadd.f32 1.0, %v2570_v40  ;;  %v2572_v17 = vpop.eup %2571  ;;  %1652 = vst [vmem:[%s3184_s23 + $0x1a0] sm:$0xff] %v1524_v1  ;;  %2587 = vtanh.f32 %v4045_v29  ;;  %v750_v8 = vadd.f32 %v3617_v38, %v3885_v48 }
 0x20a   : > { %v1527_v26 = vmul.f32 %v1399_v16, %v3973_v24  ;;  %v2574_v33 = vpop.eup %2573  ;;  %v1398_v22 = vadd.f32 1.0, %v2572_v17  ;;  %2589 = vtanh.f32 %v4049_v9  ;;  %v4063_v31 = vmul.f32 0.5, %v755_v61 }
 0x20b   : > { %1716 = vst [vmem:[%s3184_s23 + $0x3a0] sm:$0xff] %v1588_v36  ;;  %v1591_v52 = vmul.f32 %v1463_v32, %v3975_v44  ;;  %v1462_v24 = vadd.f32 1.0, %v2574_v33  ;;  %v4066_v7 = vmul.f32 0.5, %v1075_v46  ;;  %v4068_v0 = vmul.f32 0.5, %v750_v8 }
 0x20c   : > { %1655 = vst [vmem:[%s3184_s23 + $0x1b8] sm:$0xff] %v1527_v26  ;;  %v1070_v3 = vadd.f32 %v3617_v38, %v3887_v28  ;;  %v2576_v48 = vpop.eup %2575  ;;  %v1526_v42 = vmul.f32 %v1398_v22, %v3989_v47  ;;  %2591 = vtanh.f32 %v4063_v31  ;;  %v765_v44 = vadd.f32 %v3617_v38, %v3907_v14 }
 0x20d   : > { %1719 = vst [vmem:[%s3184_s23 + $0x3b8] sm:$0xff] %v1591_v52  ;;  %v1085_v20 = vadd.f32 %v3617_v38, %v3909_v62  ;;  %v2578_v45 = vpop.eup %2577  ;;  %v1590_v6 = vmul.f32 %v1462_v24, %v3993_v23  ;;  %v1401_v18 = vadd.f32 1.0, %v2576_v48  ;;  %2593 = vtanh.f32 %v4066_v7 }
 0x20e   : > { %v1212_v28 = vmul.f32 0.5, %v1070_v3  ;;  %v2580_v10 = vpop.eup %2579  ;;  %1654 = vst [vmem:[%s3184_s23 + $0x1b0] sm:$0xff] %v1526_v42  ;;  %v1465_v27 = vadd.f32 1.0, %v2578_v45  ;;  %2595 = vtanh.f32 %v4068_v0  ;;  %v1151_v47 = vmul.f32 0.5, %v765_v44 }
 0x20f   : > { %v1215_v21 = vmul.f32 0.5, %v1085_v20  ;;  %1718 = vst [vmem:[%s3184_s23 + $0x3b0] sm:$0xff] %v1590_v6  ;;  %v1529_v14 = vmul.f32 %v1401_v18, %v4007_v50  ;;  %v1400_v62 = vadd.f32 1.0, %v2580_v10  ;;  %v760_v23 = vadd.f32 %v3617_v38, %v3917_v11 }
 0x210   : > { %v2582_v58 = vpop.eup %2581  ;;  %2597 = vtanh.f32 %v1212_v28  ;;  %v1593_v49 = vmul.f32 %v1465_v27, %v4010_v57  ;;  %v1080_v59 = vadd.f32 %v3617_v38, %v3919_v56 }
 0x211   : > { %v2584_v43 = vpop.eup %2583  ;;  %v1464_v54 = vadd.f32 1.0, %v2582_v58  ;;  %2599 = vtanh.f32 %v1151_v47  ;;  %1657 = vst [vmem:[%s3184_s23 + $0x1c8] sm:$0xff] %v1529_v14  ;;  %v1528_v13 = vmul.f32 %v1400_v62, %v4012_v37  ;;  %v1150_v41 = vmul.f32 0.5, %v760_v23 }
 0x212   : > { %v2586_v30 = vpop.eup %2585  ;;  %v1403_v50 = vadd.f32 1.0, %v2584_v43  ;;  %2601 = vtanh.f32 %v1215_v21  ;;  %1721 = vst [vmem:[%s3184_s23 + $0x3c8] sm:$0xff] %v1593_v49  ;;  %v1214_v57 = vmul.f32 0.5, %v1080_v59 }
 0x213   : > { %v1592_v11 = vmul.f32 %v1464_v54, %v4025_v2  ;;  %v1467_v34 = vadd.f32 1.0, %v2586_v30  ;;  %v2588_v39 = vpop.eup %2587  ;;  %1656 = vst [vmem:[%s3184_s23 + $0x1c0] sm:$0xff] %v1528_v13  ;;  %2603 = vtanh.f32 %v1150_v41 }
 0x214   : > { %v1531_v51 = vmul.f32 %v1403_v50, %v4029_v63  ;;  %v2590_v38 = vpop.eup %2589  ;;  %v1402_v37 = vadd.f32 1.0, %v2588_v39  ;;  %2605 = vtanh.f32 %v1214_v57 }
 0x215   : > { %1720 = vst [vmem:[%s3184_s23 + $0x3c0] sm:$0xff] %v1592_v11  ;;  %v1595_v56 = vmul.f32 %v1467_v34, %v4031_v60  ;;  %v1466_v12 = vadd.f32 1.0, %v2590_v38 }
 0x216   : > { %1659 = vst [vmem:[%s3184_s23 + $0x1d8] sm:$0xff] %v1531_v51  ;;  %v2592_v35 = vpop.eup %2591  ;;  %v1530_v2 = vmul.f32 %v1402_v37, %v4045_v29 }
 0x217   : > { %1723 = vst [vmem:[%s3184_s23 + $0x3d8] sm:$0xff] %v1595_v56  ;;  %v2594_v25 = vpop.eup %2593  ;;  %v1594_v4 = vmul.f32 %v1466_v12, %v4049_v9  ;;  %v1405_v63 = vadd.f32 1.0, %v2592_v35 }
 0x218   : > { %v2596_v55 = vpop.eup %2595  ;;  %1658 = vst [vmem:[%s3184_s23 + $0x1d0] sm:$0xff] %v1530_v2  ;;  %v1469_v5 = vadd.f32 1.0, %v2594_v25 }
 0x219   : > { %1722 = vst [vmem:[%s3184_s23 + $0x3d0] sm:$0xff] %v1594_v4  ;;  %v1533_v60 = vmul.f32 %v1405_v63, %v4063_v31  ;;  %v1404_v15 = vadd.f32 1.0, %v2596_v55 }
 0x21a   : > { %v2598_v19 = vpop.eup %2597  ;;  %v1597_v40 = vmul.f32 %v1469_v5, %v4066_v7 }
 0x21b   : > { %v2600_v53 = vpop.eup %2599  ;;  %v1468_v1 = vadd.f32 1.0, %v2598_v19  ;;  %1661 = vst [vmem:[%s3184_s23 + $0x1e8] sm:$0xff] %v1533_v60  ;;  %v1532_v29 = vmul.f32 %v1404_v15, %v4068_v0 }
 0x21c   : > { %v2602_v16 = vpop.eup %2601  ;;  %v1407_v36 = vadd.f32 1.0, %v2600_v53  ;;  %1725 = vst [vmem:[%s3184_s23 + $0x3e8] sm:$0xff] %v1597_v40 }
 0x21d   : > { %v1596_v32 = vmul.f32 %v1468_v1, %v1212_v28  ;;  %v1471_v9 = vadd.f32 1.0, %v2602_v16  ;;  %v2604_v61 = vpop.eup %2603  ;;  %1660 = vst [vmem:[%s3184_s23 + $0x1e0] sm:$0xff] %v1532_v29  ;;  %1735 = sbr.rel (!%p4196_p9) target bundleno = 576 (0x240), region = 48 }
 0x21e   : > { %v1535_v17 = vmul.f32 %v1407_v36, %v1151_v47  ;;  %v2606_v26 = vpop.eup %2605  ;;  %v1406_v8 = vadd.f32 1.0, %v2604_v61 }
 0x21f   : > { %1724 = vst [vmem:[%s3184_s23 + $0x3e0] sm:$0xff] %v1596_v32  ;;  %v1599_v46 = vmul.f32 %v1471_v9, %v1215_v21  ;;  %v1470_v33 = vadd.f32 1.0, %v2606_v26 }
 0x220   : > { %1663 = vst [vmem:[%s3184_s23 + $0x1f8] sm:$0xff] %v1535_v17  ;;  %v1534_v52 = vmul.f32 %v1406_v8, %v1150_v41 }
 0x221   : > { %1727 = vst [vmem:[%s3184_s23 + $0x3f8] sm:$0xff] %v1599_v46  ;;  %v1598_v22 = vmul.f32 %v1470_v33, %v1214_v57 }
 0x222   : > { %1662 = vst [vmem:[%s3184_s23 + $0x1f0] sm:$0xff] %v1534_v52 }
 0x223   : > { %1726 = vst [vmem:[%s3184_s23 + $0x3f0] sm:$0xff] %v1598_v22 }
 0x224   : > { %s4205_s7 = smov (!%p1738_p10, %s1737_s7), 128 }
 0x225   : > { %s4119_s11 = sshll.u32 %s4205_s7, 7 }
 0x226   : > { %s1742_s28 = ssub.s32 16384, %s4119_s11 }
 0x227   : > { %1743 = vsyncadd %s1729_s26, %s1742_s28  ;;  %p1861_p1 = scmp.ne.s32.totalorder %s4119_s11, 0  ;;  %s1868_s24 = sshll.u32 %s2815_s16, 14 }
 0x228   : > { %s4129_s6 = scalar_lea.hbm %s4181_s3, %s1868_s24  ;;  %s1748_s4 = sshll.u32 %s3184_s23, 4  ;;  %s4132_s4 = int_to_ptr.vmem [resolvable:$true] %s1748_s4 }
 0x229   : > { %s2692_s8 = scalar_lea.vmem %s4132_s4, %s4119_s11  ;;  %s2771_s22 = smov [#allocation8]  }
 0x22a   : > { %p2693_p3 = scmp.ne.s32.totalorder %s4132_s4, %s2692_s8  ;;  %s2696_s9 = sshll.u32 %s2771_s22, 4  ;;  %s2697_s9 = int_to_ptr.vmem [resolvable:$false] %s2696_s9 }
 0x22b   : > { %s2698_s16 = scalar_lea.vmem %s2697_s9, 32768  ;;  %p2699_p11 = scmp.lt.s32.totalorder %s4132_s4, %s2697_s9 }
 0x22c   : > { %p2694_p5 = pnand %p2693_p3, %p1861_p1  ;;  %p2700_p13 = scmp.lt.s32.totalorder %s2698_s16, %s2692_s8 }
 0x22e   : > { %p2695_p6 = pneg %p2694_p5  ;;  %p2701_p0 = por %p2700_p13, %p2699_p11 }
 0x230   : > { %p2702_p12 = pnand %p2701_p0, %p2695_p6 }
 0x232   : > { %2705 = shalt.err (!%p2702_p12)
}
 0x233   : > { %s2706_s10 = scalar_lea.hbm %s4129_s6, %s4119_s11  ;;  %s2710_s27 = scalar_lea.hbm %s4181_s3, 18432 }
 0x234   : > { %p2707_p7 = scmp.ne.s32.totalorder %s4129_s6, %s2706_s10  ;;  %p2711_p9 = scmp.lt.u32.totalorder %s4129_s6, %s4181_s3 }
 0x235   : > { %p2712_p10 = scmp.lt.u32.totalorder %s2710_s27, %s2706_s10  ;;  %p2714_p5 = scmp.lt.u32.totalorder %s2706_s10, %s4129_s6 }
 0x236   : > { %p2708_p2 = pnand %p2707_p7, %p1861_p1 }
 0x237   : > { %p2713_p3 = por %p2712_p10, %p2711_p9 }
 0x238   : > { %p2709_p8 = pneg %p2708_p2 }
 0x239   : > { %p2715_p6 = por %p2714_p5, %p2713_p3 }
 0x23b   : > { %p2716_p11 = pnand %p2715_p6, %p2709_p8 }
 0x23d   : > { %2719 = shalt.err (!%p2716_p11)
}
 0x23e   : > { %s2772_s7 = smov 128   ;;  %s2773_s28 = smov 8  }
 0x23f   : > { %1754 = dma.vmem_to_hbm [thread:$0]  (%p1861_p1), %s4132_s4, %s4119_s11, %s4129_s6, %s1729_s26, %s2772_s7, %s2772_s7, %s2773_s28  }
 0x240 PF: > { %s1763_s24 = sand.u32 1, %s2750_s12   ;;  %p4197_p13 = scmp.ne.s32.totalorder %s4188_s25, 0 }
 0x241   : > { %s1764_s30 = scalar_lea.sflag [#allocation4], %s1763_s24 }
 0x242   : > { %p2303_p0 = pnand %p1844_p4, %p4197_p13 }
 0x244   : > { %2745 = dma.done.wait (!%p2303_p0), %s1764_s30, 16384  }
 0x245   : > { %2747 = vsyncadd (!%p2303_p0), %s1764_s30, 4294950912  ;;  %p17_p12 = scmp.ge.s32.totalorder %s2819_s18, 4   ;;  %s4198_s12 = smov %s2754_s13 }
 0x246   : > { %s4199_s13 = smov %s2758_s14  ;;  %s4200_s14 = smov %s2831_s21 }
 0x247   : > { %s4201_s15 = smov %s2819_s18  ;;  %19 = sbr.rel (!%p17_p12) target bundleno = 6 (0x6), region = 85 }
 0x24e   :  { %1769 = vsyncpa [#allocation3], 1 }
 0x24f   :  { %1771 = vsyncpa [#allocation3 + $0x1], 1 }
 0x250   :  { %1772 = vsyncpa [#allocation6], 1 }
 0x251   :  { %1773 = vsyncpa [#allocation4], 1 }
 0x252   :  { %1775 = vsyncpa [#allocation4 + $0x1], 1 }

</bundles_post_ra>
